<compile_context>
chip_gen: v7x
topology: tpu7x:2x2x1
jax: 0.10.0
libtpu: 0.0.40
codegen_flags: <defaults>
</compile_context>

<pallas_src>
import jax
import jax.numpy as jnp
from jax import lax
from jax.experimental import pallas as pl
from jax.experimental.pallas import tpu as pltpu

# ----------------------------- small config ---------------------------------
ATT_WINDOW = 2            # config.att_window_size
CTX_IN = 16               # config.context_in_dim (use_texts=True, no audio -> GRU in = 2*CTX_IN)
CTX_OUT = 16              # config.context_out_dim (bi-GRU -> context embed dim D = 2*CTX_OUT)
UTT_EMBED = 16            # config.utt_embed_size (== CTX_OUT so the Linear shapes line up)
D = 2 * CTX_OUT           # context embedding dim seen by the graph layers
N_UTT = 8                 # utterances in the dialogue
GRU_IN = 2 * CTX_IN
H = CTX_OUT
OUT_LANES = 128           # lane-dense padded output slab width

# ---------------- parameter-slab row offsets (8-row aligned sections) --------
R_WI = 0                  # (2*GRU_IN, 6H) = (64, 96)  block-diag over [x | rev(x)], gate-major
R_BI = 64                 # (1, 96)
R_WHB = 72                # (2H, 6H) = (32, 96)        block-diag over [h_f | h_b], gate-major
R_BH = 104                # (1, 96)
R_WREL1 = 112             # (D, 4D) = (32, 128)        layer-1 relation weights, lane-concat
R_WREL2 = 144             # (D, 4D) = (32, 128)        layer-2 relation weights
R_WAGGR = 176             # (D, 2D) = (32, 64)         [aggr_1 | aggr_2]
R_WE1 = 208               # (2D, D) = (64, 32)
R_BE1 = 272               # (1, 32)
R_WHEAD = 280             # (3D, 128) = (96, 128)      fused emotion(0:7)/sentiment(7:10) head
R_BHEAD = 376             # (1, 128)
R_TOTAL = 384

# ---------------- data-slab layout ------------------------------------------
DATA_ROWS = 16
SPK_COL_LANE = 64         # rows 0:N lane 64 = speaker id (float) as a column
# rows 0:N lanes 0:32 = x, lanes 32:64 = reverse(x); row N lanes 0:N = speaker row


# ----------------------- fused forward-pass kernel ---------------------------
def _dialogue_gcn_kernel(data_ref, p_ref, out_ref, ctx_ref):
    n = N_UTT

    # ---------------- unpack data / parameter slabs (static slices) ----------
    xcat = data_ref[0:n, 0:2 * GRU_IN]                         # (n, 64) = [x | rev(x)]
    spk_col = data_ref[0:n, SPK_COL_LANE:SPK_COL_LANE + 1]     # (n, 1)
    spk_row = data_ref[n:n + 1, 0:n]                           # (1, n)

    wi = p_ref[R_WI:R_WI + 2 * GRU_IN, :]                      # (64, 128), lanes 96: zero
    bi = p_ref[R_BI:R_BI + 1, :]                               # (1, 128)
    whb = p_ref[R_WHB:R_WHB + 2 * H, :]                        # (32, 128)
    bh = p_ref[R_BH:R_BH + 1, :]                               # (1, 128)
    wrel1 = p_ref[R_WREL1:R_WREL1 + D, :]                      # (32, 128)
    wrel2 = p_ref[R_WREL2:R_WREL2 + D, :]                      # (32, 128)
    waggr = p_ref[R_WAGGR:R_WAGGR + D, :]                      # (32, 128), lanes 64: zero
    we1 = p_ref[R_WE1:R_WE1 + 2 * D, :]                        # (64, 128), lanes 32: zero
    be1 = p_ref[R_BE1:R_BE1 + 1, :]                            # (1, 128)
    whead = p_ref[R_WHEAD:R_WHEAD + 3 * D, :]                  # (96, 128)
    bhead = p_ref[R_BHEAD:R_BHEAD + 1, :]                      # (1, 128)

    # ---------------- context_encoder: bidirectional GRU (batch=1) -----------
    # Single input-projection matmul for BOTH directions and ALL timesteps.
    # Gate-major lane layout: [r_f r_b | z_f z_b | n_f n_b] (each gate block 2H lanes).
    gx_all = jnp.dot(xcat, wi, preferred_element_type=jnp.float32) + bi   # (n, 128)

    h_cat = jnp.zeros((1, 2 * H), jnp.float32)   # [h_f | h_b]
    for s in range(n):                           # n static -> fully unrolled
        gh = jnp.dot(h_cat, whb, preferred_element_type=jnp.float32) + bh  # (1, 128)
        gx = gx_all[s:s + 1, :]
        # one sigmoid over both r and z of both directions, one tanh over n of both
        rz = jax.nn.sigmoid(gx[:, 0:4 * H] + gh[:, 0:4 * H])
        r = rz[:, 0:2 * H]
        z = rz[:, 2 * H:4 * H]
        ng = jnp.tanh(gx[:, 4 * H:6 * H] + r * gh[:, 4 * H:6 * H])
        h_cat = (1.0 - z) * ng + z * h_cat
        # per-step row stores into the VMEM ctx scratch (no list/concat tail)
        ctx_ref[s:s + 1, 0:H] = h_cat[:, 0:H]                      # fwd output, time s
        ctx_ref[n - 1 - s:n - s, H:2 * H] = h_cat[:, H:2 * H]      # bwd output, time n-1-s

    ctx = ctx_ref[...]                                             # (n, D)

    # -------- construct_edges_relations: windowed dot products, zeros outside
    #          the window, row softmax over the full row (zeros included). -----
    scores = lax.dot_general(ctx, ctx, (((1,), (1,)), ((), ())),
                             preferred_element_type=jnp.float32)   # (n, n) ctx @ ctx.T
    row_i = lax.broadcasted_iota(jnp.int32, (n, n), 0)
    col_j = lax.broadcasted_iota(jnp.int32, (n, n), 1)
    in_win = (col_j >= row_i - ATT_WINDOW) & (col_j <= row_i + ATT_WINDOW)
    s_masked = jnp.where(in_win, scores, 0.0)
    m = jnp.max(s_masked, axis=1, keepdims=True)
    e = jnp.exp(s_masked - m)
    denom = jnp.sum(e, axis=1, keepdims=True)
    inv = pl.reciprocal(denom, approx=True)            # EUP slot
    inv = inv * (2.0 - denom * inv)                    # one Newton step -> ~f32-exact
    attn = e * inv

    # ---------------------- build_relation_matrices --------------------------
    pred = (col_j >= row_i).astype(jnp.float32)        # triu(0)
    suc = 1.0 - pred
    same = (spk_col == spk_row).astype(jnp.float32)
    diff = 1.0 - same
    # (names follow the reference forward's argument binding, which itself is quirky)
    adj_a = same * pred * attn       # -> pred_rel_l{1,2} weight (gcn_w[0]/[4])
    adj_b = same * suc * attn        # -> suc_rel_l{1,2}  weight (gcn_w[1]/[5])
    adj_c = diff * pred * attn       # -> same_speak_rel_l{1,2} weight (gcn_w[2]/[6])
    adj_d = diff * suc * attn        # -> diff_speak_rel_l{1,2} weight (gcn_w[3]/[7])

    # attn.diag().unsqueeze(1) via masked row-sum (no gather)
    diag_attn = jnp.sum(jnp.where(row_i == col_j, attn, 0.0), axis=1, keepdims=True)

    # -------- two GCN blocks; 4 relation weights lane-concatenated -> one matmul
    def gcn_block(h, wrel, aggr_off):
        s_rel = jnp.dot(h, wrel, preferred_element_type=jnp.float32)     # (n, 4D)
        s_ag = jnp.dot(h, waggr, preferred_element_type=jnp.float32)     # (n, 128)
        out = (jnp.dot(adj_a, s_rel[:, 0 * D:1 * D], preferred_element_type=jnp.float32)
               + jnp.dot(adj_b, s_rel[:, 1 * D:2 * D], preferred_element_type=jnp.float32)
               + jnp.dot(adj_c, s_rel[:, 2 * D:3 * D], preferred_element_type=jnp.float32)
               + jnp.dot(adj_d, s_rel[:, 3 * D:4 * D], preferred_element_type=jnp.float32)
               + s_ag[:, aggr_off:aggr_off + D] * diag_attn)
        return jnp.maximum(out, 0.0)

    h1 = gcn_block(ctx, wrel1, 0)
    h2 = gcn_block(h1, wrel2, D)

    # ------------------------------ heads (fused) -----------------------------
    h_all = jnp.concatenate([h2, ctx], axis=1)                                   # (n, 2D)
    e1 = jnp.maximum(
        jnp.dot(h_all, we1, preferred_element_type=jnp.float32) + be1, 0.0)      # (n, 128)
    h3 = jnp.concatenate([e1[:, 0:D], h_all], axis=1)                            # (n, 3D)
    # one lane-dense (n, 128) output slab: emotion in cols 0:7, sentiment in 7:10
    out_ref[...] = jnp.dot(h3, whead, preferred_element_type=jnp.float32) + bhead


# ------------------------------ JAX wrappers ---------------------------------
_VMEM = pl.BlockSpec(memory_space=pltpu.MemorySpace.VMEM)


def dialogue_gcn_pallas(x, speakers, param_slab):
    n = x.shape[0]
    spk = speakers.astype(jnp.float32)
    # single (16, 128) data slab: [x | rev(x)] rows, speaker column, speaker row
    data = jnp.zeros((DATA_ROWS, 128), jnp.float32)
    data = data.at[0:n, 0:GRU_IN].set(x)
    data = data.at[0:n, GRU_IN:2 * GRU_IN].set(x[::-1])
    data = data.at[0:n, SPK_COL_LANE].set(spk)
    data = data.at[n, 0:n].set(spk)

    slab = pl.pallas_call(
        _dialogue_gcn_kernel,
        out_shape=jax.ShapeDtypeStruct((n, OUT_LANES), jnp.float32),
        in_specs=[_VMEM, _VMEM],
        out_specs=_VMEM,
        scratch_shapes=[pltpu.VMEM((N_UTT, D), jnp.float32)],
        cost_estimate=pl.CostEstimate(flops=600_000, transcendentals=1_000,
                                      bytes_accessed=220_000),
    )(data, param_slab)
    return slab[:, 0:7], slab[:, 7:10]


@jax.jit
def dialogue_gcn_forward(indept_embeds, speakers, param_slab):
    # indept_embeds: (1, N, 2*CTX_IN); speakers: (1, N)  (speakers.squeeze_(0))
    x = indept_embeds[0]
    spk = speakers[0]
    return dialogue_gcn_pallas(x, spk, param_slab)


# ----------------- pack natural-layout params into ONE kernel slab -----------
def pack_params(p):
    slab = jnp.zeros((R_TOTAL, 128), jnp.float32)

    # bi-GRU weights, gate-major across directions: [r_f r_b | z_f z_b | n_f n_b]
    wi = jnp.zeros((2 * GRU_IN, 6 * H), jnp.float32)
    whb = jnp.zeros((2 * H, 6 * H), jnp.float32)
    bi = jnp.zeros((1, 6 * H), jnp.float32)
    bh = jnp.zeros((1, 6 * H), jnp.float32)
    for g in range(3):                                    # g: 0=r, 1=z, 2=n
        cf = slice(2 * g * H, 2 * g * H + H)              # forward-direction lanes
        cb = slice(2 * g * H + H, 2 * g * H + 2 * H)      # backward-direction lanes
        wi = wi.at[0:GRU_IN, cf].set(p["wi_f"][g]).at[GRU_IN:, cb].set(p["wi_b"][g])
        whb = whb.at[0:H, cf].set(p["wh_f"][g]).at[H:, cb].set(p["wh_b"][g])
        bi = bi.at[:, cf].set(p["bi_f"][g]).at[:, cb].set(p["bi_b"][g])
        bh = bh.at[:, cf].set(p["bh_f"][g]).at[:, cb].set(p["bh_b"][g])

    slab = slab.at[R_WI:R_WI + 2 * GRU_IN, 0:6 * H].set(wi)
    slab = slab.at[R_BI, 0:6 * H].set(bi[0])
    slab = slab.at[R_WHB:R_WHB + 2 * H, 0:6 * H].set(whb)
    slab = slab.at[R_BH, 0:6 * H].set(bh[0])

    # GCN relation weights (lane-concat) and aggregation weights
    wrel1 = jnp.concatenate([p["gcn_w"][0], p["gcn_w"][1], p["gcn_w"][2], p["gcn_w"][3]], axis=1)
    wrel2 = jnp.concatenate([p["gcn_w"][4], p["gcn_w"][5], p["gcn_w"][6], p["gcn_w"][7]], axis=1)
    waggr = jnp.concatenate([p["aggr_w"][0], p["aggr_w"][1]], axis=1)
    slab = slab.at[R_WREL1:R_WREL1 + D, 0:4 * D].set(wrel1)
    slab = slab.at[R_WREL2:R_WREL2 + D, 0:4 * D].set(wrel2)
    slab = slab.at[R_WAGGR:R_WAGGR + D, 0:2 * D].set(waggr)

    # heads
    slab = slab.at[R_WE1:R_WE1 + 2 * D, 0:D].set(p["we1"])
    slab = slab.at[R_BE1, 0:D].set(p["be1"][0])
    slab = slab.at[R_WHEAD:R_WHEAD + D, 0:7].set(p["we2"])           # e1 -> emotion
    slab = slab.at[R_WHEAD + D:R_WHEAD + 3 * D, 7:10].set(p["ws"])   # h_all -> sentiment
    slab = slab.at[R_BHEAD, 0:7].set(p["be2"][0])
    slab = slab.at[R_BHEAD, 7:10].set(p["bs"][0])
    return slab


# ------------------------- deterministic parameter init ----------------------
def init_params(key):
    ks = jax.random.split(key, 18)

    def u(k, shape, scale):
        return jax.random.uniform(k, shape, jnp.float32, -scale, scale)

    s_gru = 1.0 / (CTX_OUT ** 0.5)
    p = {
        # context_encoder (bi-GRU), PyTorch gate order (r, z, n), stored as (in, out)
        "wi_f": u(ks[0], (3, GRU_IN, CTX_OUT), s_gru),
        "wh_f": u(ks[1], (3, CTX_OUT, CTX_OUT), s_gru),
        "bi_f": u(ks[2], (3, 1, CTX_OUT), s_gru),
        "bh_f": u(ks[3], (3, 1, CTX_OUT), s_gru),
        "wi_b": u(ks[4], (3, GRU_IN, CTX_OUT), s_gru),
        "wh_b": u(ks[5], (3, CTX_OUT, CTX_OUT), s_gru),
        "bi_b": u(ks[6], (3, 1, CTX_OUT), s_gru),
        "bh_b": u(ks[7], (3, 1, CTX_OUT), s_gru),
        # 8 GraphConvolution weights (pred/suc/same/diff, layers 1 & 2), bias=False
        "gcn_w": u(ks[8], (8, D, D), 1.0 / (D ** 0.5)),
        # w_aggr_1, w_aggr_2
        "aggr_w": u(ks[9], (2, D, D), 1.0 / (D ** 0.5)),
        # w_emotion_1 / w_emotion_2 / w_sentiment  (stored (in, out))
        "we1": u(ks[10], (2 * D, D), 1.0 / ((2 * D) ** 0.5)),
        "be1": u(ks[11], (1, D), 1.0 / ((2 * D) ** 0.5)),
        "we2": u(ks[12], (D, 7), 1.0 / (D ** 0.5)),
        "be2": u(ks[13], (1, 7), 1.0 / (D ** 0.5)),
        "ws": u(ks[14], (2 * D, 3), 1.0 / ((2 * D) ** 0.5)),
        "bs": u(ks[15], (1, 3), 1.0 / ((2 * D) ** 0.5)),
    }
    return p


# ----------------------------- pure-JAX reference ----------------------------
def _gru_dir_ref(xseq, wi, wh, bi, bh, reverse):
    n = xseq.shape[0]
    h = jnp.zeros((CTX_OUT,), jnp.float32)
    outs = [None] * n
    order = range(n - 1, -1, -1) if reverse else range(n)
    for t in order:
        xt = xseq[t]
        r = jax.nn.sigmoid(xt @ wi[0] + bi[0, 0] + h @ wh[0] + bh[0, 0])
        z = jax.nn.sigmoid(xt @ wi[1] + bi[1, 0] + h @ wh[1] + bh[1, 0])
        ng = jnp.tanh(xt @ wi[2] + bi[2, 0] + r * (h @ wh[2] + bh[2, 0]))
        h = (1.0 - z) * ng + z * h
        outs[t] = h
    return jnp.stack(outs, axis=0)


def reference_forward(indept_embeds, speakers, p):
    x = indept_embeds[0]
    spk = speakers[0]
    ctx = jnp.concatenate(
        [_gru_dir_ref(x, p["wi_f"], p["wh_f"], p["bi_f"], p["bh_f"], False),
         _gru_dir_ref(x, p["wi_b"], p["wh_b"], p["bi_b"], p["bh_b"], True)], axis=1)
    n = ctx.shape[0]
    attn = jnp.zeros((n, n), jnp.float32)
    for i in range(n):
        for j in range(max(0, i - ATT_WINDOW), min(n, i + ATT_WINDOW + 1)):
            attn = attn.at[i, j].set(jnp.dot(ctx[i], ctx[j]))
    attn = jax.nn.softmax(attn, axis=1)
    pred = jnp.triu(jnp.ones((n, n), jnp.float32))
    suc = 1.0 - pred
    same = (spk[:, None] == spk[None, :]).astype(jnp.float32)
    diff = 1.0 - same
    a1, a2, a3, a4 = same * pred * attn, same * suc * attn, diff * pred * attn, diff * suc * attn
    diag = jnp.diag(attn)[:, None]

    def block(h, base):
        out = (a1 @ (h @ p["gcn_w"][base + 0]) + a2 @ (h @ p["gcn_w"][base + 1])
               + a3 @ (h @ p["gcn_w"][base + 2]) + a4 @ (h @ p["gcn_w"][base + 3]))
        return jax.nn.relu(out + (h @ p["aggr_w"][base // 4]) * diag)

    h1 = block(ctx, 0)
    h2 = block(h1, 4)
    h = jnp.concatenate([h2, ctx], axis=1)
    emo = jax.nn.relu(h @ p["we1"] + p["be1"]) @ p["we2"] + p["be2"]
    sent = h @ p["ws"] + p["bs"]
    return emo, sent


# ------------------------------------ main -----------------------------------
if __name__ == "__main__":
    key = jax.random.PRNGKey(0)
    k_in, k_p = jax.random.split(key)
    params = init_params(k_p)
    param_slab = pack_params(params)

    # indept_embeds stands in for embed_text() output (BERT path not translatable)
    indept_embeds = jax.random.normal(k_in, (1, N_UTT, GRU_IN), jnp.float32)
    speakers = jnp.array([[0, 1, 0, 1, 1, 0, 0, 1]], dtype=jnp.int32)  # (1, N)

    emotion, sentiment = dialogue_gcn_forward(indept_embeds, speakers, param_slab)
    jax.block_until_ready((emotion, sentiment))
    assert emotion.shape == (N_UTT, 7) and sentiment.shape == (N_UTT, 3)

    emo_ref, sent_ref = reference_forward(indept_embeds, speakers, params)
    assert jnp.allclose(emotion, emo_ref, atol=1e-3, rtol=1e-3), "emotion head mismatch"
    assert jnp.allclose(sentiment, sent_ref, atol=1e-3, rtol=1e-3), "sentiment head mismatch"

    print("KERNEL_OK")
</pallas_src>

<mosaic_0001>
module attributes {stable_mosaic.version = 11 : i64} {
  func.func @_dialogue_gcn_kernel(%arg0: memref<16x128xf32, #tpu.memory_space<vmem>>, %arg1: memref<384x128xf32, #tpu.memory_space<vmem>>, %arg2: memref<8x128xf32, #tpu.memory_space<vmem>>, %arg3: memref<8x32xf32, #tpu.memory_space<vmem>>) attributes {dimension_semantics = [], scalar_prefetch = 0 : i64, scratch_operands = 1 : i64, tpu.core_type = #tpu.core_type<tc>} {
    %c0 = arith.constant 0 : index
    %c0_0 = arith.constant 0 : index
    %0 = vector.load %arg0[%c0, %c0_0] : memref<16x128xf32, #tpu.memory_space<vmem>>, vector<8x64xf32>
    %c0_1 = arith.constant 0 : index
    %c64 = arith.constant 64 : index
    %1 = vector.load %arg0[%c0_1, %c64] : memref<16x128xf32, #tpu.memory_space<vmem>>, vector<8x1xf32>
    %c8 = arith.constant 8 : index
    %c0_2 = arith.constant 0 : index
    %2 = vector.load %arg0[%c8, %c0_2] : memref<16x128xf32, #tpu.memory_space<vmem>>, vector<1x8xf32>
    %c0_3 = arith.constant 0 : index
    %c0_4 = arith.constant 0 : index
    %3 = vector.load %arg1[%c0_3, %c0_4] : memref<384x128xf32, #tpu.memory_space<vmem>>, vector<64x128xf32>
    %c64_5 = arith.constant 64 : index
    %c0_6 = arith.constant 0 : index
    %4 = vector.load %arg1[%c64_5, %c0_6] : memref<384x128xf32, #tpu.memory_space<vmem>>, vector<1x128xf32>
    %c72 = arith.constant 72 : index
    %c0_7 = arith.constant 0 : index
    %5 = vector.load %arg1[%c72, %c0_7] : memref<384x128xf32, #tpu.memory_space<vmem>>, vector<32x128xf32>
    %c104 = arith.constant 104 : index
    %c0_8 = arith.constant 0 : index
    %6 = vector.load %arg1[%c104, %c0_8] : memref<384x128xf32, #tpu.memory_space<vmem>>, vector<1x128xf32>
    %c112 = arith.constant 112 : index
    %c0_9 = arith.constant 0 : index
    %7 = vector.load %arg1[%c112, %c0_9] : memref<384x128xf32, #tpu.memory_space<vmem>>, vector<32x128xf32>
    %c144 = arith.constant 144 : index
    %c0_10 = arith.constant 0 : index
    %8 = vector.load %arg1[%c144, %c0_10] : memref<384x128xf32, #tpu.memory_space<vmem>>, vector<32x128xf32>
    %c176 = arith.constant 176 : index
    %c0_11 = arith.constant 0 : index
    %9 = vector.load %arg1[%c176, %c0_11] : memref<384x128xf32, #tpu.memory_space<vmem>>, vector<32x128xf32>
    %c208 = arith.constant 208 : index
    %c0_12 = arith.constant 0 : index
    %10 = vector.load %arg1[%c208, %c0_12] : memref<384x128xf32, #tpu.memory_space<vmem>>, vector<64x128xf32>
    %c272 = arith.constant 272 : index
    %c0_13 = arith.constant 0 : index
    %11 = vector.load %arg1[%c272, %c0_13] : memref<384x128xf32, #tpu.memory_space<vmem>>, vector<1x128xf32>
    %c280 = arith.constant 280 : index
    %c0_14 = arith.constant 0 : index
    %12 = vector.load %arg1[%c280, %c0_14] : memref<384x128xf32, #tpu.memory_space<vmem>>, vector<96x128xf32>
    %c376 = arith.constant 376 : index
    %c0_15 = arith.constant 0 : index
    %13 = vector.load %arg1[%c376, %c0_15] : memref<384x128xf32, #tpu.memory_space<vmem>>, vector<1x128xf32>
    %cst = arith.constant dense<0.000000e+00> : vector<8x128xf32>
    %14 = tpu.matmul %0, %3, %cst {dimension_numbers = #tpu.dot_dimension_numbers<[1], [0], [0], [1], [0, 0, 1, 1], [], []>} : vector<8x64xf32>, vector<64x128xf32>, vector<8x128xf32> -> vector<8x128xf32>
    %15 = vector.broadcast %4 : vector<1x128xf32> to vector<8x128xf32>
    %16 = arith.addf %14, %15 : vector<8x128xf32>
    %cst_16 = arith.constant 0.000000e+00 : f32
    %17 = vector.broadcast %cst_16 : f32 to vector<1x32xf32>
    %cst_17 = arith.constant dense<0.000000e+00> : vector<1x128xf32>
    %18 = tpu.matmul %17, %5, %cst_17 {dimension_numbers = #tpu.dot_dimension_numbers<[1], [0], [0], [1], [0, 0, 1, 1], [], []>} : vector<1x32xf32>, vector<32x128xf32>, vector<1x128xf32> -> vector<1x128xf32>
    %19 = arith.addf %18, %6 : vector<1x128xf32>
    %20 = vector.extract_strided_slice %16 {offsets = [0, 0], sizes = [1, 128], strides = [1, 1]} : vector<8x128xf32> to vector<1x128xf32>
    %21 = vector.extract_strided_slice %20 {offsets = [0, 0], sizes = [1, 64], strides = [1, 1]} : vector<1x128xf32> to vector<1x64xf32>
    %22 = vector.extract_strided_slice %19 {offsets = [0, 0], sizes = [1, 64], strides = [1, 1]} : vector<1x128xf32> to vector<1x64xf32>
    %23 = arith.addf %21, %22 : vector<1x64xf32>
    %24 = arith.negf %23 : vector<1x64xf32>
    %25 = math.exp %24 : vector<1x64xf32>
    %cst_18 = arith.constant 1.000000e+00 : f32
    %26 = vector.broadcast %cst_18 : f32 to vector<1x64xf32>
    %27 = arith.addf %26, %25 : vector<1x64xf32>
    %28 = arith.divf %26, %27 : vector<1x64xf32>
    %29 = vector.extract_strided_slice %28 {offsets = [0, 0], sizes = [1, 32], strides = [1, 1]} : vector<1x64xf32> to vector<1x32xf32>
    %30 = vector.extract_strided_slice %28 {offsets = [0, 32], sizes = [1, 32], strides = [1, 1]} : vector<1x64xf32> to vector<1x32xf32>
    %31 = vector.extract_strided_slice %20 {offsets = [0, 64], sizes = [1, 32], strides = [1, 1]} : vector<1x128xf32> to vector<1x32xf32>
    %32 = vector.extract_strided_slice %19 {offsets = [0, 64], sizes = [1, 32], strides = [1, 1]} : vector<1x128xf32> to vector<1x32xf32>
    %33 = arith.mulf %29, %32 : vector<1x32xf32>
    %34 = arith.addf %31, %33 : vector<1x32xf32>
    %35 = math.tanh %34 : vector<1x32xf32>
    %cst_19 = arith.constant 1.000000e+00 : f32
    %36 = vector.broadcast %cst_19 : f32 to vector<1x32xf32>
    %37 = arith.subf %36, %30 : vector<1x32xf32>
    %38 = arith.mulf %37, %35 : vector<1x32xf32>
    %39 = arith.mulf %30, %17 : vector<1x32xf32>
    %40 = arith.addf %38, %39 : vector<1x32xf32>
    %41 = vector.extract_strided_slice %40 {offsets = [0, 0], sizes = [1, 16], strides = [1, 1]} : vector<1x32xf32> to vector<1x16xf32>
    %c0_20 = arith.constant 0 : index
    %c0_21 = arith.constant 0 : index
    %42 = vector.load %arg3[%c0_20, %c0_21] : memref<8x32xf32, #tpu.memory_space<vmem>>, vector<1x16xf32>
    tpu.vector_store %arg3[%c0_20, %c0_21], %41 {strides = array<i32>} : memref<8x32xf32, #tpu.memory_space<vmem>>, vector<1x16xf32>,
    %43 = vector.extract_strided_slice %40 {offsets = [0, 16], sizes = [1, 16], strides = [1, 1]} : vector<1x32xf32> to vector<1x16xf32>
    %c7 = arith.constant 7 : index
    %c16 = arith.constant 16 : index
    %44 = vector.load %arg3[%c7, %c16] : memref<8x32xf32, #tpu.memory_space<vmem>>, vector<1x16xf32>
    tpu.vector_store %arg3[%c7, %c16], %43 {strides = array<i32>} : memref<8x32xf32, #tpu.memory_space<vmem>>, vector<1x16xf32>,
    %cst_22 = arith.constant dense<0.000000e+00> : vector<1x128xf32>
    %45 = tpu.matmul %40, %5, %cst_22 {dimension_numbers = #tpu.dot_dimension_numbers<[1], [0], [0], [1], [0, 0, 1, 1], [], []>} : vector<1x32xf32>, vector<32x128xf32>, vector<1x128xf32> -> vector<1x128xf32>
    %46 = arith.addf %45, %6 : vector<1x128xf32>
    %47 = vector.extract_strided_slice %16 {offsets = [1, 0], sizes = [1, 128], strides = [1, 1]} : vector<8x128xf32> to vector<1x128xf32>
    %48 = vector.extract_strided_slice %47 {offsets = [0, 0], sizes = [1, 64], strides = [1, 1]} : vector<1x128xf32> to vector<1x64xf32>
    %49 = vector.extract_strided_slice %46 {offsets = [0, 0], sizes = [1, 64], strides = [1, 1]} : vector<1x128xf32> to vector<1x64xf32>
    %50 = arith.addf %48, %49 : vector<1x64xf32>
    %51 = arith.negf %50 : vector<1x64xf32>
    %52 = math.exp %51 : vector<1x64xf32>
    %cst_23 = arith.constant 1.000000e+00 : f32
    %53 = vector.broadcast %cst_23 : f32 to vector<1x64xf32>
    %54 = arith.addf %53, %52 : vector<1x64xf32>
    %55 = arith.divf %53, %54 : vector<1x64xf32>
    %56 = vector.extract_strided_slice %55 {offsets = [0, 0], sizes = [1, 32], strides = [1, 1]} : vector<1x64xf32> to vector<1x32xf32>
    %57 = vector.extract_strided_slice %55 {offsets = [0, 32], sizes = [1, 32], strides = [1, 1]} : vector<1x64xf32> to vector<1x32xf32>
    %58 = vector.extract_strided_slice %47 {offsets = [0, 64], sizes = [1, 32], strides = [1, 1]} : vector<1x128xf32> to vector<1x32xf32>
    %59 = vector.extract_strided_slice %46 {offsets = [0, 64], sizes = [1, 32], strides = [1, 1]} : vector<1x128xf32> to vector<1x32xf32>
    %60 = arith.mulf %56, %59 : vector<1x32xf32>
    %61 = arith.addf %58, %60 : vector<1x32xf32>
    %62 = math.tanh %61 : vector<1x32xf32>
    %cst_24 = arith.constant 1.000000e+00 : f32
    %63 = vector.broadcast %cst_24 : f32 to vector<1x32xf32>
    %64 = arith.subf %63, %57 : vector<1x32xf32>
    %65 = arith.mulf %64, %62 : vector<1x32xf32>
    %66 = arith.mulf %57, %40 : vector<1x32xf32>
    %67 = arith.addf %65, %66 : vector<1x32xf32>
    %68 = vector.extract_strided_slice %67 {offsets = [0, 0], sizes = [1, 16], strides = [1, 1]} : vector<1x32xf32> to vector<1x16xf32>
    %c1 = arith.constant 1 : index
    %c0_25 = arith.constant 0 : index
    %69 = vector.load %arg3[%c1, %c0_25] : memref<8x32xf32, #tpu.memory_space<vmem>>, vector<1x16xf32>
    tpu.vector_store %arg3[%c1, %c0_25], %68 {strides = array<i32>} : memref<8x32xf32, #tpu.memory_space<vmem>>, vector<1x16xf32>,
    %70 = vector.extract_strided_slice %67 {offsets = [0, 16], sizes = [1, 16], strides = [1, 1]} : vector<1x32xf32> to vector<1x16xf32>
    %c6 = arith.constant 6 : index
    %c16_26 = arith.constant 16 : index
    %71 = vector.load %arg3[%c6, %c16_26] : memref<8x32xf32, #tpu.memory_space<vmem>>, vector<1x16xf32>
    tpu.vector_store %arg3[%c6, %c16_26], %70 {strides = array<i32>} : memref<8x32xf32, #tpu.memory_space<vmem>>, vector<1x16xf32>,
    %cst_27 = arith.constant dense<0.000000e+00> : vector<1x128xf32>
    %72 = tpu.matmul %67, %5, %cst_27 {dimension_numbers = #tpu.dot_dimension_numbers<[1], [0], [0], [1], [0, 0, 1, 1], [], []>} : vector<1x32xf32>, vector<32x128xf32>, vector<1x128xf32> -> vector<1x128xf32>
    %73 = arith.addf %72, %6 : vector<1x128xf32>
    %74 = vector.extract_strided_slice %16 {offsets = [2, 0], sizes = [1, 128], strides = [1, 1]} : vector<8x128xf32> to vector<1x128xf32>
    %75 = vector.extract_strided_slice %74 {offsets = [0, 0], sizes = [1, 64], strides = [1, 1]} : vector<1x128xf32> to vector<1x64xf32>
    %76 = vector.extract_strided_slice %73 {offsets = [0, 0], sizes = [1, 64], strides = [1, 1]} : vector<1x128xf32> to vector<1x64xf32>
    %77 = arith.addf %75, %76 : vector<1x64xf32>
    %78 = arith.negf %77 : vector<1x64xf32>
    %79 = math.exp %78 : vector<1x64xf32>
    %cst_28 = arith.constant 1.000000e+00 : f32
    %80 = vector.broadcast %cst_28 : f32 to vector<1x64xf32>
    %81 = arith.addf %80, %79 : vector<1x64xf32>
    %82 = arith.divf %80, %81 : vector<1x64xf32>
    %83 = vector.extract_strided_slice %82 {offsets = [0, 0], sizes = [1, 32], strides = [1, 1]} : vector<1x64xf32> to vector<1x32xf32>
    %84 = vector.extract_strided_slice %82 {offsets = [0, 32], sizes = [1, 32], strides = [1, 1]} : vector<1x64xf32> to vector<1x32xf32>
    %85 = vector.extract_strided_slice %74 {offsets = [0, 64], sizes = [1, 32], strides = [1, 1]} : vector<1x128xf32> to vector<1x32xf32>
    %86 = vector.extract_strided_slice %73 {offsets = [0, 64], sizes = [1, 32], strides = [1, 1]} : vector<1x128xf32> to vector<1x32xf32>
    %87 = arith.mulf %83, %86 : vector<1x32xf32>
    %88 = arith.addf %85, %87 : vector<1x32xf32>
    %89 = math.tanh %88 : vector<1x32xf32>
    %cst_29 = arith.constant 1.000000e+00 : f32
    %90 = vector.broadcast %cst_29 : f32 to vector<1x32xf32>
    %91 = arith.subf %90, %84 : vector<1x32xf32>
    %92 = arith.mulf %91, %89 : vector<1x32xf32>
    %93 = arith.mulf %84, %67 : vector<1x32xf32>
    %94 = arith.addf %92, %93 : vector<1x32xf32>
    %95 = vector.extract_strided_slice %94 {offsets = [0, 0], sizes = [1, 16], strides = [1, 1]} : vector<1x32xf32> to vector<1x16xf32>
    %c2 = arith.constant 2 : index
    %c0_30 = arith.constant 0 : index
    %96 = vector.load %arg3[%c2, %c0_30] : memref<8x32xf32, #tpu.memory_space<vmem>>, vector<1x16xf32>
    tpu.vector_store %arg3[%c2, %c0_30], %95 {strides = array<i32>} : memref<8x32xf32, #tpu.memory_space<vmem>>, vector<1x16xf32>,
    %97 = vector.extract_strided_slice %94 {offsets = [0, 16], sizes = [1, 16], strides = [1, 1]} : vector<1x32xf32> to vector<1x16xf32>
    %c5 = arith.constant 5 : index
    %c16_31 = arith.constant 16 : index
    %98 = vector.load %arg3[%c5, %c16_31] : memref<8x32xf32, #tpu.memory_space<vmem>>, vector<1x16xf32>
    tpu.vector_store %arg3[%c5, %c16_31], %97 {strides = array<i32>} : memref<8x32xf32, #tpu.memory_space<vmem>>, vector<1x16xf32>,
    %cst_32 = arith.constant dense<0.000000e+00> : vector<1x128xf32>
    %99 = tpu.matmul %94, %5, %cst_32 {dimension_numbers = #tpu.dot_dimension_numbers<[1], [0], [0], [1], [0, 0, 1, 1], [], []>} : vector<1x32xf32>, vector<32x128xf32>, vector<1x128xf32> -> vector<1x128xf32>
    %100 = arith.addf %99, %6 : vector<1x128xf32>
    %101 = vector.extract_strided_slice %16 {offsets = [3, 0], sizes = [1, 128], strides = [1, 1]} : vector<8x128xf32> to vector<1x128xf32>
    %102 = vector.extract_strided_slice %101 {offsets = [0, 0], sizes = [1, 64], strides = [1, 1]} : vector<1x128xf32> to vector<1x64xf32>
    %103 = vector.extract_strided_slice %100 {offsets = [0, 0], sizes = [1, 64], strides = [1, 1]} : vector<1x128xf32> to vector<1x64xf32>
    %104 = arith.addf %102, %103 : vector<1x64xf32>
    %105 = arith.negf %104 : vector<1x64xf32>
    %106 = math.exp %105 : vector<1x64xf32>
    %cst_33 = arith.constant 1.000000e+00 : f32
    %107 = vector.broadcast %cst_33 : f32 to vector<1x64xf32>
    %108 = arith.addf %107, %106 : vector<1x64xf32>
    %109 = arith.divf %107, %108 : vector<1x64xf32>
    %110 = vector.extract_strided_slice %109 {offsets = [0, 0], sizes = [1, 32], strides = [1, 1]} : vector<1x64xf32> to vector<1x32xf32>
    %111 = vector.extract_strided_slice %109 {offsets = [0, 32], sizes = [1, 32], strides = [1, 1]} : vector<1x64xf32> to vector<1x32xf32>
    %112 = vector.extract_strided_slice %101 {offsets = [0, 64], sizes = [1, 32], strides = [1, 1]} : vector<1x128xf32> to vector<1x32xf32>
    %113 = vector.extract_strided_slice %100 {offsets = [0, 64], sizes = [1, 32], strides = [1, 1]} : vector<1x128xf32> to vector<1x32xf32>
    %114 = arith.mulf %110, %113 : vector<1x32xf32>
    %115 = arith.addf %112, %114 : vector<1x32xf32>
    %116 = math.tanh %115 : vector<1x32xf32>
    %cst_34 = arith.constant 1.000000e+00 : f32
    %117 = vector.broadcast %cst_34 : f32 to vector<1x32xf32>
    %118 = arith.subf %117, %111 : vector<1x32xf32>
    %119 = arith.mulf %118, %116 : vector<1x32xf32>
    %120 = arith.mulf %111, %94 : vector<1x32xf32>
    %121 = arith.addf %119, %120 : vector<1x32xf32>
    %122 = vector.extract_strided_slice %121 {offsets = [0, 0], sizes = [1, 16], strides = [1, 1]} : vector<1x32xf32> to vector<1x16xf32>
    %c3 = arith.constant 3 : index
    %c0_35 = arith.constant 0 : index
    %123 = vector.load %arg3[%c3, %c0_35] : memref<8x32xf32, #tpu.memory_space<vmem>>, vector<1x16xf32>
    tpu.vector_store %arg3[%c3, %c0_35], %122 {strides = array<i32>} : memref<8x32xf32, #tpu.memory_space<vmem>>, vector<1x16xf32>,
    %124 = vector.extract_strided_slice %121 {offsets = [0, 16], sizes = [1, 16], strides = [1, 1]} : vector<1x32xf32> to vector<1x16xf32>
    %c4 = arith.constant 4 : index
    %c16_36 = arith.constant 16 : index
    %125 = vector.load %arg3[%c4, %c16_36] : memref<8x32xf32, #tpu.memory_space<vmem>>, vector<1x16xf32>
    tpu.vector_store %arg3[%c4, %c16_36], %124 {strides = array<i32>} : memref<8x32xf32, #tpu.memory_space<vmem>>, vector<1x16xf32>,
    %cst_37 = arith.constant dense<0.000000e+00> : vector<1x128xf32>
    %126 = tpu.matmul %121, %5, %cst_37 {dimension_numbers = #tpu.dot_dimension_numbers<[1], [0], [0], [1], [0, 0, 1, 1], [], []>} : vector<1x32xf32>, vector<32x128xf32>, vector<1x128xf32> -> vector<1x128xf32>
    %127 = arith.addf %126, %6 : vector<1x128xf32>
    %128 = vector.extract_strided_slice %16 {offsets = [4, 0], sizes = [1, 128], strides = [1, 1]} : vector<8x128xf32> to vector<1x128xf32>
    %129 = vector.extract_strided_slice %128 {offsets = [0, 0], sizes = [1, 64], strides = [1, 1]} : vector<1x128xf32> to vector<1x64xf32>
    %130 = vector.extract_strided_slice %127 {offsets = [0, 0], sizes = [1, 64], strides = [1, 1]} : vector<1x128xf32> to vector<1x64xf32>
    %131 = arith.addf %129, %130 : vector<1x64xf32>
    %132 = arith.negf %131 : vector<1x64xf32>
    %133 = math.exp %132 : vector<1x64xf32>
    %cst_38 = arith.constant 1.000000e+00 : f32
    %134 = vector.broadcast %cst_38 : f32 to vector<1x64xf32>
    %135 = arith.addf %134, %133 : vector<1x64xf32>
    %136 = arith.divf %134, %135 : vector<1x64xf32>
    %137 = vector.extract_strided_slice %136 {offsets = [0, 0], sizes = [1, 32], strides = [1, 1]} : vector<1x64xf32> to vector<1x32xf32>
    %138 = vector.extract_strided_slice %136 {offsets = [0, 32], sizes = [1, 32], strides = [1, 1]} : vector<1x64xf32> to vector<1x32xf32>
    %139 = vector.extract_strided_slice %128 {offsets = [0, 64], sizes = [1, 32], strides = [1, 1]} : vector<1x128xf32> to vector<1x32xf32>
    %140 = vector.extract_strided_slice %127 {offsets = [0, 64], sizes = [1, 32], strides = [1, 1]} : vector<1x128xf32> to vector<1x32xf32>
    %141 = arith.mulf %137, %140 : vector<1x32xf32>
    %142 = arith.addf %139, %141 : vector<1x32xf32>
    %143 = math.tanh %142 : vector<1x32xf32>
    %cst_39 = arith.constant 1.000000e+00 : f32
    %144 = vector.broadcast %cst_39 : f32 to vector<1x32xf32>
    %145 = arith.subf %144, %138 : vector<1x32xf32>
    %146 = arith.mulf %145, %143 : vector<1x32xf32>
    %147 = arith.mulf %138, %121 : vector<1x32xf32>
    %148 = arith.addf %146, %147 : vector<1x32xf32>
    %149 = vector.extract_strided_slice %148 {offsets = [0, 0], sizes = [1, 16], strides = [1, 1]} : vector<1x32xf32> to vector<1x16xf32>
    %c4_40 = arith.constant 4 : index
    %c0_41 = arith.constant 0 : index
    %150 = vector.load %arg3[%c4_40, %c0_41] : memref<8x32xf32, #tpu.memory_space<vmem>>, vector<1x16xf32>
    tpu.vector_store %arg3[%c4_40, %c0_41], %149 {strides = array<i32>} : memref<8x32xf32, #tpu.memory_space<vmem>>, vector<1x16xf32>,
    %151 = vector.extract_strided_slice %148 {offsets = [0, 16], sizes = [1, 16], strides = [1, 1]} : vector<1x32xf32> to vector<1x16xf32>
    %c3_42 = arith.constant 3 : index
    %c16_43 = arith.constant 16 : index
    %152 = vector.load %arg3[%c3_42, %c16_43] : memref<8x32xf32, #tpu.memory_space<vmem>>, vector<1x16xf32>
    tpu.vector_store %arg3[%c3_42, %c16_43], %151 {strides = array<i32>} : memref<8x32xf32, #tpu.memory_space<vmem>>, vector<1x16xf32>,
    %cst_44 = arith.constant dense<0.000000e+00> : vector<1x128xf32>
    %153 = tpu.matmul %148, %5, %cst_44 {dimension_numbers = #tpu.dot_dimension_numbers<[1], [0], [0], [1], [0, 0, 1, 1], [], []>} : vector<1x32xf32>, vector<32x128xf32>, vector<1x128xf32> -> vector<1x128xf32>
    %154 = arith.addf %153, %6 : vector<1x128xf32>
    %155 = vector.extract_strided_slice %16 {offsets = [5, 0], sizes = [1, 128], strides = [1, 1]} : vector<8x128xf32> to vector<1x128xf32>
    %156 = vector.extract_strided_slice %155 {offsets = [0, 0], sizes = [1, 64], strides = [1, 1]} : vector<1x128xf32> to vector<1x64xf32>
    %157 = vector.extract_strided_slice %154 {offsets = [0, 0], sizes = [1, 64], strides = [1, 1]} : vector<1x128xf32> to vector<1x64xf32>
    %158 = arith.addf %156, %157 : vector<1x64xf32>
    %159 = arith.negf %158 : vector<1x64xf32>
    %160 = math.exp %159 : vector<1x64xf32>
    %cst_45 = arith.constant 1.000000e+00 : f32
    %161 = vector.broadcast %cst_45 : f32 to vector<1x64xf32>
    %162 = arith.addf %161, %160 : vector<1x64xf32>
    %163 = arith.divf %161, %162 : vector<1x64xf32>
    %164 = vector.extract_strided_slice %163 {offsets = [0, 0], sizes = [1, 32], strides = [1, 1]} : vector<1x64xf32> to vector<1x32xf32>
    %165 = vector.extract_strided_slice %163 {offsets = [0, 32], sizes = [1, 32], strides = [1, 1]} : vector<1x64xf32> to vector<1x32xf32>
    %166 = vector.extract_strided_slice %155 {offsets = [0, 64], sizes = [1, 32], strides = [1, 1]} : vector<1x128xf32> to vector<1x32xf32>
    %167 = vector.extract_strided_slice %154 {offsets = [0, 64], sizes = [1, 32], strides = [1, 1]} : vector<1x128xf32> to vector<1x32xf32>
    %168 = arith.mulf %164, %167 : vector<1x32xf32>
    %169 = arith.addf %166, %168 : vector<1x32xf32>
    %170 = math.tanh %169 : vector<1x32xf32>
    %cst_46 = arith.constant 1.000000e+00 : f32
    %171 = vector.broadcast %cst_46 : f32 to vector<1x32xf32>
    %172 = arith.subf %171, %165 : vector<1x32xf32>
    %173 = arith.mulf %172, %170 : vector<1x32xf32>
    %174 = arith.mulf %165, %148 : vector<1x32xf32>
    %175 = arith.addf %173, %174 : vector<1x32xf32>
    %176 = vector.extract_strided_slice %175 {offsets = [0, 0], sizes = [1, 16], strides = [1, 1]} : vector<1x32xf32> to vector<1x16xf32>
    %c5_47 = arith.constant 5 : index
    %c0_48 = arith.constant 0 : index
    %177 = vector.load %arg3[%c5_47, %c0_48] : memref<8x32xf32, #tpu.memory_space<vmem>>, vector<1x16xf32>
    tpu.vector_store %arg3[%c5_47, %c0_48], %176 {strides = array<i32>} : memref<8x32xf32, #tpu.memory_space<vmem>>, vector<1x16xf32>,
    %178 = vector.extract_strided_slice %175 {offsets = [0, 16], sizes = [1, 16], strides = [1, 1]} : vector<1x32xf32> to vector<1x16xf32>
    %c2_49 = arith.constant 2 : index
    %c16_50 = arith.constant 16 : index
    %179 = vector.load %arg3[%c2_49, %c16_50] : memref<8x32xf32, #tpu.memory_space<vmem>>, vector<1x16xf32>
    tpu.vector_store %arg3[%c2_49, %c16_50], %178 {strides = array<i32>} : memref<8x32xf32, #tpu.memory_space<vmem>>, vector<1x16xf32>,
    %cst_51 = arith.constant dense<0.000000e+00> : vector<1x128xf32>
    %180 = tpu.matmul %175, %5, %cst_51 {dimension_numbers = #tpu.dot_dimension_numbers<[1], [0], [0], [1], [0, 0, 1, 1], [], []>} : vector<1x32xf32>, vector<32x128xf32>, vector<1x128xf32> -> vector<1x128xf32>
    %181 = arith.addf %180, %6 : vector<1x128xf32>
    %182 = vector.extract_strided_slice %16 {offsets = [6, 0], sizes = [1, 128], strides = [1, 1]} : vector<8x128xf32> to vector<1x128xf32>
    %183 = vector.extract_strided_slice %182 {offsets = [0, 0], sizes = [1, 64], strides = [1, 1]} : vector<1x128xf32> to vector<1x64xf32>
    %184 = vector.extract_strided_slice %181 {offsets = [0, 0], sizes = [1, 64], strides = [1, 1]} : vector<1x128xf32> to vector<1x64xf32>
    %185 = arith.addf %183, %184 : vector<1x64xf32>
    %186 = arith.negf %185 : vector<1x64xf32>
    %187 = math.exp %186 : vector<1x64xf32>
    %cst_52 = arith.constant 1.000000e+00 : f32
    %188 = vector.broadcast %cst_52 : f32 to vector<1x64xf32>
    %189 = arith.addf %188, %187 : vector<1x64xf32>
    %190 = arith.divf %188, %189 : vector<1x64xf32>
    %191 = vector.extract_strided_slice %190 {offsets = [0, 0], sizes = [1, 32], strides = [1, 1]} : vector<1x64xf32> to vector<1x32xf32>
    %192 = vector.extract_strided_slice %190 {offsets = [0, 32], sizes = [1, 32], strides = [1, 1]} : vector<1x64xf32> to vector<1x32xf32>
    %193 = vector.extract_strided_slice %182 {offsets = [0, 64], sizes = [1, 32], strides = [1, 1]} : vector<1x128xf32> to vector<1x32xf32>
    %194 = vector.extract_strided_slice %181 {offsets = [0, 64], sizes = [1, 32], strides = [1, 1]} : vector<1x128xf32> to vector<1x32xf32>
    %195 = arith.mulf %191, %194 : vector<1x32xf32>
    %196 = arith.addf %193, %195 : vector<1x32xf32>
    %197 = math.tanh %196 : vector<1x32xf32>
    %cst_53 = arith.constant 1.000000e+00 : f32
    %198 = vector.broadcast %cst_53 : f32 to vector<1x32xf32>
    %199 = arith.subf %198, %192 : vector<1x32xf32>
    %200 = arith.mulf %199, %197 : vector<1x32xf32>
    %201 = arith.mulf %192, %175 : vector<1x32xf32>
    %202 = arith.addf %200, %201 : vector<1x32xf32>
    %203 = vector.extract_strided_slice %202 {offsets = [0, 0], sizes = [1, 16], strides = [1, 1]} : vector<1x32xf32> to vector<1x16xf32>
    %c6_54 = arith.constant 6 : index
    %c0_55 = arith.constant 0 : index
    %204 = vector.load %arg3[%c6_54, %c0_55] : memref<8x32xf32, #tpu.memory_space<vmem>>, vector<1x16xf32>
    tpu.vector_store %arg3[%c6_54, %c0_55], %203 {strides = array<i32>} : memref<8x32xf32, #tpu.memory_space<vmem>>, vector<1x16xf32>,
    %205 = vector.extract_strided_slice %202 {offsets = [0, 16], sizes = [1, 16], strides = [1, 1]} : vector<1x32xf32> to vector<1x16xf32>
    %c1_56 = arith.constant 1 : index
    %c16_57 = arith.constant 16 : index
    %206 = vector.load %arg3[%c1_56, %c16_57] : memref<8x32xf32, #tpu.memory_space<vmem>>, vector<1x16xf32>
    tpu.vector_store %arg3[%c1_56, %c16_57], %205 {strides = array<i32>} : memref<8x32xf32, #tpu.memory_space<vmem>>, vector<1x16xf32>,
    %cst_58 = arith.constant dense<0.000000e+00> : vector<1x128xf32>
    %207 = tpu.matmul %202, %5, %cst_58 {dimension_numbers = #tpu.dot_dimension_numbers<[1], [0], [0], [1], [0, 0, 1, 1], [], []>} : vector<1x32xf32>, vector<32x128xf32>, vector<1x128xf32> -> vector<1x128xf32>
    %208 = arith.addf %207, %6 : vector<1x128xf32>
    %209 = vector.extract_strided_slice %16 {offsets = [7, 0], sizes = [1, 128], strides = [1, 1]} : vector<8x128xf32> to vector<1x128xf32>
    %210 = vector.extract_strided_slice %209 {offsets = [0, 0], sizes = [1, 64], strides = [1, 1]} : vector<1x128xf32> to vector<1x64xf32>
    %211 = vector.extract_strided_slice %208 {offsets = [0, 0], sizes = [1, 64], strides = [1, 1]} : vector<1x128xf32> to vector<1x64xf32>
    %212 = arith.addf %210, %211 : vector<1x64xf32>
    %213 = arith.negf %212 : vector<1x64xf32>
    %214 = math.exp %213 : vector<1x64xf32>
    %cst_59 = arith.constant 1.000000e+00 : f32
    %215 = vector.broadcast %cst_59 : f32 to vector<1x64xf32>
    %216 = arith.addf %215, %214 : vector<1x64xf32>
    %217 = arith.divf %215, %216 : vector<1x64xf32>
    %218 = vector.extract_strided_slice %217 {offsets = [0, 0], sizes = [1, 32], strides = [1, 1]} : vector<1x64xf32> to vector<1x32xf32>
    %219 = vector.extract_strided_slice %217 {offsets = [0, 32], sizes = [1, 32], strides = [1, 1]} : vector<1x64xf32> to vector<1x32xf32>
    %220 = vector.extract_strided_slice %209 {offsets = [0, 64], sizes = [1, 32], strides = [1, 1]} : vector<1x128xf32> to vector<1x32xf32>
    %221 = vector.extract_strided_slice %208 {offsets = [0, 64], sizes = [1, 32], strides = [1, 1]} : vector<1x128xf32> to vector<1x32xf32>
    %222 = arith.mulf %218, %221 : vector<1x32xf32>
    %223 = arith.addf %220, %222 : vector<1x32xf32>
    %224 = math.tanh %223 : vector<1x32xf32>
    %cst_60 = arith.constant 1.000000e+00 : f32
    %225 = vector.broadcast %cst_60 : f32 to vector<1x32xf32>
    %226 = arith.subf %225, %219 : vector<1x32xf32>
    %227 = arith.mulf %226, %224 : vector<1x32xf32>
    %228 = arith.mulf %219, %202 : vector<1x32xf32>
    %229 = arith.addf %227, %228 : vector<1x32xf32>
    %230 = vector.extract_strided_slice %229 {offsets = [0, 0], sizes = [1, 16], strides = [1, 1]} : vector<1x32xf32> to vector<1x16xf32>
    %c7_61 = arith.constant 7 : index
    %c0_62 = arith.constant 0 : index
    %231 = vector.load %arg3[%c7_61, %c0_62] : memref<8x32xf32, #tpu.memory_space<vmem>>, vector<1x16xf32>
    tpu.vector_store %arg3[%c7_61, %c0_62], %230 {strides = array<i32>} : memref<8x32xf32, #tpu.memory_space<vmem>>, vector<1x16xf32>,
    %232 = vector.extract_strided_slice %229 {offsets = [0, 16], sizes = [1, 16], strides = [1, 1]} : vector<1x32xf32> to vector<1x16xf32>
    %c0_63 = arith.constant 0 : index
    %c16_64 = arith.constant 16 : index
    %233 = vector.load %arg3[%c0_63, %c16_64] : memref<8x32xf32, #tpu.memory_space<vmem>>, vector<1x16xf32>
    tpu.vector_store %arg3[%c0_63, %c16_64], %232 {strides = array<i32>} : memref<8x32xf32, #tpu.memory_space<vmem>>, vector<1x16xf32>,
    %c0_65 = arith.constant 0 : index
    %c0_66 = arith.constant 0 : index
    %234 = vector.load %arg3[%c0_65, %c0_66] : memref<8x32xf32, #tpu.memory_space<vmem>>, vector<8x32xf32>
    %cst_67 = arith.constant dense<0.000000e+00> : vector<8x8xf32>
    %235 = tpu.matmul %234, %234, %cst_67 {dimension_numbers = #tpu.dot_dimension_numbers<[1], [1], [0], [0], [0, 0, 1, 0], [], []>} : vector<8x32xf32>, vector<8x32xf32>, vector<8x8xf32> -> vector<8x8xf32>
    %236 = tpu.iota {dimensions = array<i32: 0>} : vector<8x8xi32>
    %237 = tpu.iota {dimensions = array<i32: 1>} : vector<8x8xi32>
    %c2_i32 = arith.constant 2 : i32
    %238 = vector.broadcast %c2_i32 : i32 to vector<8x8xi32>
    %239 = arith.subi %236, %238 : vector<8x8xi32>
    %240 = arith.cmpi sge, %237, %239 : vector<8x8xi32>
    %c2_i32_68 = arith.constant 2 : i32
    %241 = vector.broadcast %c2_i32_68 : i32 to vector<8x8xi32>
    %242 = arith.addi %236, %241 : vector<8x8xi32>
    %243 = arith.cmpi sle, %237, %242 : vector<8x8xi32>
    %244 = arith.andi %240, %243 : vector<8x8xi1>
    %cst_69 = arith.constant 0.000000e+00 : f32
    %245 = vector.broadcast %cst_69 : f32 to vector<8x8xf32>
    %246 = arith.select %244, %235, %245 : vector<8x8xi1>, vector<8x8xf32>
    %cst_70 = arith.constant dense<0xFF800000> : vector<8xf32>
    %247 = vector.multi_reduction <maximumf>, %246, %cst_70 [1] : vector<8x8xf32> to vector<8xf32>
    %248 = vector.shape_cast %247 : vector<8xf32> to vector<8x1xf32>
    %249 = vector.broadcast %248 : vector<8x1xf32> to vector<8x8xf32>
    %250 = arith.subf %246, %249 : vector<8x8xf32>
    %251 = math.exp %250 : vector<8x8xf32>
    %cst_71 = arith.constant dense<0.000000e+00> : vector<8xf32>
    %252 = vector.multi_reduction <add>, %251, %cst_71 [1] : vector<8x8xf32> to vector<8xf32>
    %253 = vector.shape_cast %252 : vector<8xf32> to vector<8x1xf32>
    %254 = tpu.reciprocal %253 {approx = true} : vector<8x1xf32> -> vector<8x1xf32>
    %255 = arith.mulf %253, %254 : vector<8x1xf32>
    %cst_72 = arith.constant 2.000000e+00 : f32
    %256 = vector.broadcast %cst_72 : f32 to vector<8x1xf32>
    %257 = arith.subf %256, %255 : vector<8x1xf32>
    %258 = arith.mulf %254, %257 : vector<8x1xf32>
    %259 = vector.broadcast %258 : vector<8x1xf32> to vector<8x8xf32>
    %260 = arith.mulf %251, %259 : vector<8x8xf32>
    %261 = arith.cmpi sge, %237, %236 : vector<8x8xi32>
    %262 = arith.extui %261 : vector<8x8xi1> to vector<8x8xi32>
    %263 = arith.sitofp %262 : vector<8x8xi32> to vector<8x8xf32>
    %cst_73 = arith.constant 1.000000e+00 : f32
    %264 = vector.broadcast %cst_73 : f32 to vector<8x8xf32>
    %265 = arith.subf %264, %263 : vector<8x8xf32>
    %266 = vector.broadcast %1 : vector<8x1xf32> to vector<8x8xf32>
    %267 = vector.broadcast %2 : vector<1x8xf32> to vector<8x8xf32>
    %268 = arith.cmpf oeq, %266, %267 : vector<8x8xf32>
    %269 = arith.extui %268 : vector<8x8xi1> to vector<8x8xi32>
    %270 = arith.sitofp %269 : vector<8x8xi32> to vector<8x8xf32>
    %cst_74 = arith.constant 1.000000e+00 : f32
    %271 = vector.broadcast %cst_74 : f32 to vector<8x8xf32>
    %272 = arith.subf %271, %270 : vector<8x8xf32>
    %273 = arith.mulf %270, %263 : vector<8x8xf32>
    %274 = arith.mulf %273, %260 : vector<8x8xf32>
    %275 = arith.mulf %270, %265 : vector<8x8xf32>
    %276 = arith.mulf %275, %260 : vector<8x8xf32>
    %277 = arith.mulf %272, %263 : vector<8x8xf32>
    %278 = arith.mulf %277, %260 : vector<8x8xf32>
    %279 = arith.mulf %272, %265 : vector<8x8xf32>
    %280 = arith.mulf %279, %260 : vector<8x8xf32>
    %281 = arith.cmpi eq, %236, %237 : vector<8x8xi32>
    %cst_75 = arith.constant 0.000000e+00 : f32
    %282 = vector.broadcast %cst_75 : f32 to vector<8x8xf32>
    %283 = arith.select %281, %260, %282 : vector<8x8xi1>, vector<8x8xf32>
    %cst_76 = arith.constant dense<0.000000e+00> : vector<8xf32>
    %284 = vector.multi_reduction <add>, %283, %cst_76 [1] : vector<8x8xf32> to vector<8xf32>
    %285 = vector.shape_cast %284 : vector<8xf32> to vector<8x1xf32>
    %cst_77 = arith.constant dense<0.000000e+00> : vector<8x128xf32>
    %286 = tpu.matmul %234, %7, %cst_77 {dimension_numbers = #tpu.dot_dimension_numbers<[1], [0], [0], [1], [0, 0, 1, 1], [], []>} : vector<8x32xf32>, vector<32x128xf32>, vector<8x128xf32> -> vector<8x128xf32>
    %cst_78 = arith.constant dense<0.000000e+00> : vector<8x128xf32>
    %287 = tpu.matmul %234, %9, %cst_78 {dimension_numbers = #tpu.dot_dimension_numbers<[1], [0], [0], [1], [0, 0, 1, 1], [], []>} : vector<8x32xf32>, vector<32x128xf32>, vector<8x128xf32> -> vector<8x128xf32>
    %288 = vector.extract_strided_slice %286 {offsets = [0, 0], sizes = [8, 32], strides = [1, 1]} : vector<8x128xf32> to vector<8x32xf32>
    %cst_79 = arith.constant dense<0.000000e+00> : vector<8x32xf32>
    %289 = tpu.matmul %274, %288, %cst_79 {dimension_numbers = #tpu.dot_dimension_numbers<[1], [0], [0], [1], [0, 0, 1, 1], [], []>} : vector<8x8xf32>, vector<8x32xf32>, vector<8x32xf32> -> vector<8x32xf32>
    %290 = vector.extract_strided_slice %286 {offsets = [0, 32], sizes = [8, 32], strides = [1, 1]} : vector<8x128xf32> to vector<8x32xf32>
    %cst_80 = arith.constant dense<0.000000e+00> : vector<8x32xf32>
    %291 = tpu.matmul %276, %290, %cst_80 {dimension_numbers = #tpu.dot_dimension_numbers<[1], [0], [0], [1], [0, 0, 1, 1], [], []>} : vector<8x8xf32>, vector<8x32xf32>, vector<8x32xf32> -> vector<8x32xf32>
    %292 = arith.addf %289, %291 : vector<8x32xf32>
    %293 = vector.extract_strided_slice %286 {offsets = [0, 64], sizes = [8, 32], strides = [1, 1]} : vector<8x128xf32> to vector<8x32xf32>
    %cst_81 = arith.constant dense<0.000000e+00> : vector<8x32xf32>
    %294 = tpu.matmul %278, %293, %cst_81 {dimension_numbers = #tpu.dot_dimension_numbers<[1], [0], [0], [1], [0, 0, 1, 1], [], []>} : vector<8x8xf32>, vector<8x32xf32>, vector<8x32xf32> -> vector<8x32xf32>
    %295 = arith.addf %292, %294 : vector<8x32xf32>
    %296 = vector.extract_strided_slice %286 {offsets = [0, 96], sizes = [8, 32], strides = [1, 1]} : vector<8x128xf32> to vector<8x32xf32>
    %cst_82 = arith.constant dense<0.000000e+00> : vector<8x32xf32>
    %297 = tpu.matmul %280, %296, %cst_82 {dimension_numbers = #tpu.dot_dimension_numbers<[1], [0], [0], [1], [0, 0, 1, 1], [], []>} : vector<8x8xf32>, vector<8x32xf32>, vector<8x32xf32> -> vector<8x32xf32>
    %298 = arith.addf %295, %297 : vector<8x32xf32>
    %299 = vector.extract_strided_slice %287 {offsets = [0, 0], sizes = [8, 32], strides = [1, 1]} : vector<8x128xf32> to vector<8x32xf32>
    %300 = vector.broadcast %285 : vector<8x1xf32> to vector<8x32xf32>
    %301 = arith.mulf %299, %300 : vector<8x32xf32>
    %302 = arith.addf %298, %301 : vector<8x32xf32>
    %cst_83 = arith.constant 0.000000e+00 : f32
    %303 = vector.broadcast %cst_83 : f32 to vector<8x32xf32>
    %304 = arith.maximumf %302, %303 : vector<8x32xf32>
    %cst_84 = arith.constant dense<0.000000e+00> : vector<8x128xf32>
    %305 = tpu.matmul %304, %8, %cst_84 {dimension_numbers = #tpu.dot_dimension_numbers<[1], [0], [0], [1], [0, 0, 1, 1], [], []>} : vector<8x32xf32>, vector<32x128xf32>, vector<8x128xf32> -> vector<8x128xf32>
    %cst_85 = arith.constant dense<0.000000e+00> : vector<8x128xf32>
    %306 = tpu.matmul %304, %9, %cst_85 {dimension_numbers = #tpu.dot_dimension_numbers<[1], [0], [0], [1], [0, 0, 1, 1], [], []>} : vector<8x32xf32>, vector<32x128xf32>, vector<8x128xf32> -> vector<8x128xf32>
    %307 = vector.extract_strided_slice %305 {offsets = [0, 0], sizes = [8, 32], strides = [1, 1]} : vector<8x128xf32> to vector<8x32xf32>
    %cst_86 = arith.constant dense<0.000000e+00> : vector<8x32xf32>
    %308 = tpu.matmul %274, %307, %cst_86 {dimension_numbers = #tpu.dot_dimension_numbers<[1], [0], [0], [1], [0, 0, 1, 1], [], []>} : vector<8x8xf32>, vector<8x32xf32>, vector<8x32xf32> -> vector<8x32xf32>
    %309 = vector.extract_strided_slice %305 {offsets = [0, 32], sizes = [8, 32], strides = [1, 1]} : vector<8x128xf32> to vector<8x32xf32>
    %cst_87 = arith.constant dense<0.000000e+00> : vector<8x32xf32>
    %310 = tpu.matmul %276, %309, %cst_87 {dimension_numbers = #tpu.dot_dimension_numbers<[1], [0], [0], [1], [0, 0, 1, 1], [], []>} : vector<8x8xf32>, vector<8x32xf32>, vector<8x32xf32> -> vector<8x32xf32>
    %311 = arith.addf %308, %310 : vector<8x32xf32>
    %312 = vector.extract_strided_slice %305 {offsets = [0, 64], sizes = [8, 32], strides = [1, 1]} : vector<8x128xf32> to vector<8x32xf32>
    %cst_88 = arith.constant dense<0.000000e+00> : vector<8x32xf32>
    %313 = tpu.matmul %278, %312, %cst_88 {dimension_numbers = #tpu.dot_dimension_numbers<[1], [0], [0], [1], [0, 0, 1, 1], [], []>} : vector<8x8xf32>, vector<8x32xf32>, vector<8x32xf32> -> vector<8x32xf32>
    %314 = arith.addf %311, %313 : vector<8x32xf32>
    %315 = vector.extract_strided_slice %305 {offsets = [0, 96], sizes = [8, 32], strides = [1, 1]} : vector<8x128xf32> to vector<8x32xf32>
    %cst_89 = arith.constant dense<0.000000e+00> : vector<8x32xf32>
    %316 = tpu.matmul %280, %315, %cst_89 {dimension_numbers = #tpu.dot_dimension_numbers<[1], [0], [0], [1], [0, 0, 1, 1], [], []>} : vector<8x8xf32>, vector<8x32xf32>, vector<8x32xf32> -> vector<8x32xf32>
    %317 = arith.addf %314, %316 : vector<8x32xf32>
    %318 = vector.extract_strided_slice %306 {offsets = [0, 32], sizes = [8, 32], strides = [1, 1]} : vector<8x128xf32> to vector<8x32xf32>
    %319 = vector.broadcast %285 : vector<8x1xf32> to vector<8x32xf32>
    %320 = arith.mulf %318, %319 : vector<8x32xf32>
    %321 = arith.addf %317, %320 : vector<8x32xf32>
    %cst_90 = arith.constant 0.000000e+00 : f32
    %322 = vector.broadcast %cst_90 : f32 to vector<8x32xf32>
    %323 = arith.maximumf %321, %322 : vector<8x32xf32>
    %324 = tpu.concatenate %323, %234 in 1 : vector<8x32xf32>, vector<8x32xf32> -> vector<8x64xf32>
    %cst_91 = arith.constant dense<0.000000e+00> : vector<8x128xf32>
    %325 = tpu.matmul %324, %10, %cst_91 {dimension_numbers = #tpu.dot_dimension_numbers<[1], [0], [0], [1], [0, 0, 1, 1], [], []>} : vector<8x64xf32>, vector<64x128xf32>, vector<8x128xf32> -> vector<8x128xf32>
    %326 = vector.broadcast %11 : vector<1x128xf32> to vector<8x128xf32>
    %327 = arith.addf %325, %326 : vector<8x128xf32>
    %cst_92 = arith.constant 0.000000e+00 : f32
    %328 = vector.broadcast %cst_92 : f32 to vector<8x128xf32>
    %329 = arith.maximumf %327, %328 : vector<8x128xf32>
    %330 = vector.extract_strided_slice %329 {offsets = [0, 0], sizes = [8, 32], strides = [1, 1]} : vector<8x128xf32> to vector<8x32xf32>
    %331 = tpu.concatenate %330, %324 in 1 : vector<8x32xf32>, vector<8x64xf32> -> vector<8x96xf32>
    %cst_93 = arith.constant dense<0.000000e+00> : vector<8x128xf32>
    %332 = tpu.matmul %331, %12, %cst_93 {dimension_numbers = #tpu.dot_dimension_numbers<[1], [0], [0], [1], [0, 0, 1, 1], [], []>} : vector<8x96xf32>, vector<96x128xf32>, vector<8x128xf32> -> vector<8x128xf32>
    %333 = vector.broadcast %13 : vector<1x128xf32> to vector<8x128xf32>
    %334 = arith.addf %332, %333 : vector<8x128xf32>
    %c0_94 = arith.constant 0 : index
    %c0_95 = arith.constant 0 : index
    %335 = vector.load %arg2[%c0_94, %c0_95] : memref<8x128xf32, #tpu.memory_space<vmem>>, vector<8x128xf32>
    tpu.vector_store %arg2[%c0_94, %c0_95], %334 {strides = array<i32>} : memref<8x128xf32, #tpu.memory_space<vmem>>, vector<8x128xf32>,
    return
  }
}

</mosaic_0001>

<bundles_post_ra>
// kernel: dialogue_gcn_forward.1
= control target key start
LH: loop header
LB: loop body
LE: loop exit
PB: predicated region body
PF: predicated region fallthrough
CT: control target
= control target key end

     0   :  { %7 = vsyncpa [#allocation4], 0  ;;  %s2827_s9 = smov [#allocation3]   ;;  %s3148_s0 = inlined_call_operand.vmem [shape: f32[16,128], index: 0, kind: input, shape index: {}]   ;;  %s3149_s1 = inlined_call_operand.hbm [shape: f32[384,128], index: 1, kind: input, shape index: {}]   ;;  %s3150_s2 = inlined_call_operand.vmem [shape: f32[8,128], index: 2, kind: output, shape index: {}]  }
   0x1   :  { %s15_s10 = sshll.u32 %s2827_s9, 4  ;;  %s2803_s13 = scalar_lea.hbm %s3149_s1, 6144  ;;  %s16_s10 = int_to_ptr.vmem [resolvable:$true] %s15_s10 }
   0x2   :  { %p2804_p0 = scmp.ne.s32.totalorder %s3149_s1, %s2803_s13  ;;  %p2807_p1 = scmp.lt.u32.totalorder %s2803_s13, %s3149_s1 }
   0x4   :  { %p2809_p2 = pnand %p2807_p1, %p2804_p0 }
   0x6   :  { %2812 = shalt.err (!%p2809_p2)
}
   0x7   :  { %s2813_s18 = scalar_lea.vmem %s16_s10, 6144  ;;  %p2818_p4 = scmp.lt.s32.totalorder %s16_s10, %s16_s10 }
   0x8   :  { %p2814_p3 = scmp.ne.s32.totalorder %s16_s10, %s2813_s18  ;;  %p2819_p5 = scmp.lt.s32.totalorder %s2813_s18, %s2813_s18 }
   0xa   :  { %p2820_p6 = por %p2819_p5, %p2818_p4 }
   0xc   :  { %p2821_p7 = pnand %p2820_p6, %p2814_p3 }
   0xe   :  { %2824 = shalt.err (!%p2821_p7)
}
   0xf   :  { %s2828_s19 = smov 128   ;;  %s2829_s20 = smov 8  }
  0x10   :  { %21 = dma.hbm_to_vmem [thread:$0]  %s3149_s1, 6144, %s16_s10, [#allocation4], %s2828_s19, %s2828_s19, %s2829_s20  }
  0x11   :  { %2825 = dma.done.wait [#allocation4], 6144  }
  0x12   :  { %2826 = vsyncadd [#allocation4], 4294961152  ;;  %v2830_v0 = vmov 0.0|0.0   ;;  %vm2831_vm0 = vmmov 0   ;;  %v2832_v1 = vmov 0.0   ;;  %v27_v2 = vld [vmem:[#allocation3] sm:$0xff] }
  0x13   :  { %2626 = vmatprep.subr.bf16.mxu0 %v2830_v0  ;;  %2638 = vmatprep.subr.bf16.mxu1 %v2830_v0  ;;  %v28_v3 = vld [vmem:[#allocation3 + $0x8] sm:$0xff]  ;;  %v37_v6 = vld [vmem:[#allocation3 + $0x50] sm:$0xff]  ;;  %v30_v8 = vld [vmem:[#allocation3 + $0x18] sm:$0xff]  ;;  %vm79_vm1 = vcmask 523264   ;;  %s2833_s24 = smov 64   ;;  %s2834_s25 = smov 96  }
  0x14   :  { %2411 = vmatprep.mubr.msk.f32.mxu1 %vm2831_vm0, %v2832_v1  ;;  %2400 = vmatprep.mubr.msk.f32.mxu0 %vm2831_vm0, %v2832_v1  ;;  %v36_v4 = vld [vmem:[#allocation3 + $0x48] sm:$0xff]  ;;  %v2627_v5 = vpack.c.bf16 %v28_v3, %v27_v2  ;;  %v29_v7 = vld [vmem:[#allocation3 + $0x10] sm:$0xff]  ;;  %v38_v10 = vld [vmem:[#allocation3 + $0x58] sm:$0xff]  ;;  %vm257_vm2 = vcmask 122880   ;;  %vm259_vm3 = vcmask 254080   ;;  %vm153_vm4 = vcmask 261120  }
  0x15   :  { %v2870_v9 = vpack.c.bf16 %v37_v6, %v36_v4  ;;  %v39_v11 = vld [vmem:[#allocation3 + $0x60] sm:$0xff]  ;;  %v2630_v12 = vpack.c.bf16 %v30_v8, %v29_v7  ;;  %v32_v15 = vld [vmem:[#allocation3 + $0x28] sm:$0xff]  ;;  %v33_v17 = vld [vmem:[#allocation3 + $0x30] sm:$0xff]  ;;  %vm367_vm5 = vcmask 123905   ;;  %vm369_vm6 = vcmask 255105   ;;  %s2836_s26 = smov 32  }
  0x16   :  { %2628 = vmatpush3.bf16.msra.mxu0 %v2627_v5  ;;  %v2874_v13 = vpack.c.bf16 %v39_v11, %v38_v10  ;;  %v31_v14 = vld [vmem:[#allocation3 + $0x20] sm:$0xff]  ;;  %v34_v18 = vld [vmem:[#allocation3 + $0x38] sm:$0xff]  ;;  %v2902_v21 = vld [vmem:[#allocation3 + $0x68] sm:$0x1]  ;;  %vm593_vm7 = vcmask 125955   ;;  %vm595_vm8 = vcmask 257155  }
  0x17   :  { %2640 = vmatpush3.bf16.msra.mxu1 %v2870_v9  ;;  %2629 = vmatprep.subr.bf16.mxu0 %v2830_v0  ;;  %v2633_v16 = vpack.c.bf16 %v32_v15, %v31_v14  ;;  %v2636_v19 = vpack.c.bf16 %v34_v18, %v33_v17  ;;  %v2889_v20 = vld [vmem:[%s3148_s0] sm:$0xff]  ;;  %v2236_v27 = vld [vmem:[#allocation3 + $0x40] ss:$0 sm:$0xff]  ;;  %vm480_vm9 = vcmask 124930   ;;  %vm482_vm10 = vcmask 256130  }
  0x18   :  { %2641 = vmatprep.subr.bf16.mxu1 %v2830_v0  ;;  %vm819_vm11 = vcmask 128005   ;;  %vm821_vm12 = vcmask 259205   ;;  %vm706_vm13 = vcmask 126980   ;;  %vm708_vm14 = vcmask 258180  }
  0x19   :  { %vm932_vm15 = vcmask 129030  }
  0x1a   :  { %2631 = vmatpush3.bf16.msra.mxu0 %v2630_v12 }
  0x1b   :  { %2643 = vmatpush3.bf16.msra.mxu1 %v2874_v13  ;;  %2632 = vmatprep.subr.bf16.mxu0 %v2830_v0 }
  0x1c   :  { %2644 = vmatprep.subr.bf16.mxu1 %v2830_v0 }
  0x1e   :  { %2412 = vmatmul.mubr.f32.vlgmr.msra.gmra.mrb[0].mxu1 %v2832_v1  ;;  %2634 = vmatpush3.bf16.msra.mxu0 %v2633_v16 }
  0x1f   :  { %2635 = vmatprep.subr.bf16.mxu0 %v2830_v0  ;;  %2646 = vmatpush3.bf16.msra.mxu1 %v2870_v9 }
  0x20   :  { %2647 = vmatprep.subr.bf16.mxu1 %v2830_v0  ;;  %2422 = vmatprep.mubr.msk.f32.mxu1 %vm2831_vm0, %v2832_v1 }
  0x22   :  { %2637 = vmatpush3.bf16.msra.mxu0 %v2636_v19 }
  0x23   :  { %2649 = vmatpush3.bf16.msra.mxu1 %v2874_v13  ;;  %2662 = vmatprep.subr.bf16.mxu0 %v2830_v0 }
  0x24   :  { %2650 = vmatprep.subr.bf16.mxu1 %v2830_v0 }
  0x25   :  { %2401 = vmatmul.mubr.msk.f32.vlgmr.msra.gmra.mrb[0].mxu0 %vm79_vm1, %v2889_v20 }
  0x26   :  { %2664 = vmatpush3.bf16.msra.mxu0 %v2870_v9  ;;  %2455 = vmatprep.mubr.msk.f32.mxu0 %vm2831_vm0, %v2832_v1 }
  0x27   :  { %2665 = vmatprep.subr.bf16.mxu0 %v2830_v0 }
  0x2a   :  { %2667 = vmatpush3.bf16.msra.mxu0 %v2874_v13 }
  0x2b   :  { %2674 = vmatprep.subr.bf16.mxu0 %v2830_v0 }
  0xf1   :  { %v223_v22 = vpop.f32.mrb[0].mxu1 }
  0xf2   :  { %v224_v23 = vadd.f32 %v223_v22, %v2902_v21  ;;  %v2413_v24 = vpop.f32.mrb[1].mxu1 }
  0xf4   :  { %235 = vrot.lane.b32.xlu0 %v224_v23, %s2833_s24 }
  0xf8   :  { %v149_v25 = vpop.f32.mrb[0].mxu0 }
  0xf9   :  { %v2402_v26 = vpop.f32.mrb[1].mxu0  ;;  %v2906_v28 = vadd.f32 %v2236_v27, %v149_v25 }
  0xfb   :  { %v227_v29 = vadd.f32 %v224_v23, %v2906_v28 }
  0xfd   :  { %v2238_v30 = vmul.f32 -1.442695, %v227_v29 }
  0xff   :  { %2751 = vpow2.f32 %v2238_v30 }
 0x109   :  { %v2752_v31 = vpop.eup %2751 }
 0x10a   :  { %v231_v32 = vadd.f32 1.0, %v2752_v31 }
 0x10c   :  { %2753 = vrcp.f32 %v231_v32 }
 0x116   :  { %v2754_v33 = vpop.eup %2753 }
 0x117   :  { %v245_v39 = vsub.f32 1.0, %v2754_v33  ;;  %v251_v41 = vmul.f32 0.0, %v2754_v33 }
 0x166   :  { %v236_v34 = vpop.permute.xlu0 %235 }
 0x167   :  { %v238_v35 = vmul.f32 %v2754_v33, %v236_v34 }
 0x169   :  { %240 = vrot.lane.b32.xlu0 %v238_v35, %s2833_s24 }
 0x1db   :  { %v241_v36 = vpop.permute.xlu0 %240 }
 0x1dc   :  { %v243_v37 = vadd.f32 %v241_v36, %v2906_v28 }
 0x1de   :  { %2755 = vtanh.f32 %v243_v37 }
 0x1e8   :  { %v2756_v38 = vpop.eup %2755 }
 0x1e9   :  { %247 = vrot.lane.b32.xlu1 %v2756_v38, %s2834_s25 }
 0x25b   :  { %v248_v40 = vpop.permute.xlu1 %247 }
 0x25c   :  { %v250_v42 = vmul.f32 %v248_v40, %v245_v39 }
 0x25e   :  { %v252_v43 = vadd.f32 %v251_v41, %v250_v42 }
 0x260   :  { %254 = vrot.lane.b32.xlu1 %v252_v43, %s2834_s25  ;;  %v359_v59 = vrot.slane %v252_v43, 7 }
 0x2d2   :  { %v255_v44 = vpop.permute.xlu1 %254 }
 0x2d3   :  { %258 = vst.msk [vmem:[#allocation2] sm:$0x1] %vm257_vm2, %v255_v44  ;;  %2423 = vmatmul.mubr.msk.f32.vlgmr.msra.gmra.mrb[2].mxu1 %vm153_vm4, %v255_v44  ;;  %vm934_vm2 = vcmask 260230  }
 0x2d4   :  { %260 = vst.msk [vmem:[#allocation2 + $0x7] sm:$0x1] %vm259_vm3, %v255_v44  ;;  %2652 = vmatpush3.bf16.msra.mxu1 %v2870_v9  ;;  %2433 = vmatprep.mubr.msk.f32.mxu1 %vm2831_vm0, %v2832_v1  ;;  %vm1045_vm3 = vcmask 130055  }
 0x2d5   :  { %2653 = vmatprep.subr.bf16.mxu1 %v2830_v0 }
 0x2d8   :  { %2655 = vmatpush3.bf16.msra.mxu1 %v2874_v13 }
 0x2d9   :  { %2656 = vmatprep.subr.bf16.mxu1 %v2830_v0 }
 0x3a6   :  { %v329_v45 = vpop.f32.mrb[2].mxu1 }
 0x3a7   :  { %v330_v46 = vadd.f32 %v329_v45, %v2902_v21  ;;  %v2424_v47 = vpop.f32.mrb[3].mxu1 }
 0x3a9   :  { %v334_v48 = vrot.slane %v330_v46, 7 }
 0x3ab   :  { %343 = vrot.lane.b32.xlu0 %v334_v48, %s2833_s24  ;;  %v336_v49 = vadd.f32 %v334_v48, %v2906_v28 }
 0x3ad   :  { %v2240_v50 = vmul.f32 -1.442695, %v336_v49 }
 0x3af   :  { %2757 = vpow2.f32 %v2240_v50 }
 0x3b9   :  { %v2758_v51 = vpop.eup %2757 }
 0x3ba   :  { %v340_v52 = vadd.f32 1.0, %v2758_v51 }
 0x3bc   :  { %2759 = vrcp.f32 %v340_v52 }
 0x3c6   :  { %v2760_v53 = vpop.eup %2759 }
 0x3c7   :  { %v353_v60 = vsub.f32 1.0, %v2760_v53  ;;  %v361_v63 = vmul.f32 %v2760_v53, %v359_v59 }
 0x41d   :  { %v344_v54 = vpop.permute.xlu0 %343 }
 0x41e   :  { %v346_v55 = vmul.f32 %v2760_v53, %v344_v54 }
 0x420   :  { %348 = vrot.lane.b32.xlu1 %v346_v55, %s2833_s24 }
 0x492   :  { %v349_v56 = vpop.permute.xlu1 %348 }
 0x493   :  { %v351_v57 = vadd.f32 %v349_v56, %v2906_v28 }
 0x495   :  { %2761 = vtanh.f32 %v351_v57 }
 0x49f   :  { %v2762_v58 = vpop.eup %2761 }
 0x4a0   :  { %355 = vrot.lane.b32.xlu0 %v2762_v58, %s2834_s25 }
 0x512   :  { %v356_v61 = vpop.permute.xlu0 %355 }
 0x513   :  { %v358_v62 = vmul.f32 %v356_v61, %v353_v60 }
 0x515   :  { %v2926_v2 = vadd.f32 %v361_v63, %v358_v62 }
 0x517   :  { %v371_v3 = vrot.slane %v2926_v2, 1  ;;  %v472_v24 = vrot.slane %v2926_v2, 7 }
 0x519   :  { %372 = vrot.lane.b32.xlu1 %v371_v3, %s2834_s25 }
 0x58b   :  { %v373_v4 = vpop.permute.xlu1 %372 }
 0x58c   :  { %2434 = vmatmul.mubr.msk.f32.vlgmr.msra.gmra.mrb[4].mxu1 %vm153_vm4, %v373_v4 }
 0x58d   :  { %2658 = vmatpush3.bf16.msra.mxu1 %v2870_v9  ;;  %2444 = vmatprep.mubr.msk.f32.mxu1 %vm2831_vm0, %v2832_v1 }
 0x58e   :  { %2659 = vmatprep.subr.bf16.mxu1 %v2830_v0 }
 0x591   :  { %2661 = vmatpush3.bf16.msra.mxu1 %v2874_v13 }
 0x592   :  { %2668 = vmatprep.subr.bf16.mxu1 %v2830_v0 }
 0x65f   :  { %v442_v5 = vpop.f32.mrb[4].mxu1 }
 0x660   :  { %v443_v6 = vadd.f32 %v442_v5, %v2902_v21  ;;  %v2435_v7 = vpop.f32.mrb[5].mxu1 }
 0x662   :  { %v447_v8 = vrot.slane %v443_v6, 6 }
 0x664   :  { %456 = vrot.lane.b32.xlu0 %v447_v8, %s2833_s24  ;;  %v449_v10 = vadd.f32 %v447_v8, %v2906_v28 }
 0x666   :  { %v2242_v11 = vmul.f32 -1.442695, %v449_v10 }
 0x668   :  { %2763 = vpow2.f32 %v2242_v11 }
 0x672   :  { %v2764_v12 = vpop.eup %2763 }
 0x673   :  { %v453_v14 = vadd.f32 1.0, %v2764_v12 }
 0x675   :  { %2765 = vrcp.f32 %v453_v14 }
 0x67f   :  { %v2766_v15 = vpop.eup %2765 }
 0x680   :  { %v466_v23 = vsub.f32 1.0, %v2766_v15  ;;  %v474_v26 = vmul.f32 %v2766_v15, %v472_v24 }
 0x6d6   :  { %v457_v16 = vpop.permute.xlu0 %456 }
 0x6d7   :  { %v459_v17 = vmul.f32 %v2766_v15, %v457_v16 }
 0x6d9   :  { %461 = vrot.lane.b32.xlu1 %v459_v17, %s2833_s24 }
 0x74b   :  { %v462_v18 = vpop.permute.xlu1 %461 }
 0x74c   :  { %v464_v19 = vadd.f32 %v462_v18, %v2906_v28 }
 0x74e   :  { %2767 = vtanh.f32 %v464_v19 }
 0x758   :  { %v2768_v22 = vpop.eup %2767 }
 0x759   :  { %468 = vrot.lane.b32.xlu0 %v2768_v22, %s2834_s25 }
 0x7cb   :  { %v469_v25 = vpop.permute.xlu0 %468 }
 0x7cc   :  { %v471_v27 = vmul.f32 %v469_v25, %v466_v23 }
 0x7ce   :  { %v2944_v29 = vadd.f32 %v474_v26, %v471_v27 }
 0x7d0   :  { %v484_v30 = vrot.slane %v2944_v29, 2  ;;  %v585_v47 = vrot.slane %v2944_v29, 7 }
 0x7d2   :  { %485 = vrot.lane.b32.xlu1 %v484_v30, %s2834_s25 }
 0x844   :  { %v486_v31 = vpop.permute.xlu1 %485 }
 0x845   :  { %2445 = vmatmul.mubr.msk.f32.vlgmr.msra.gmra.mrb[6].mxu1 %vm153_vm4, %v486_v31 }
 0x846   :  { %2670 = vmatpush3.bf16.msra.mxu1 %v2870_v9  ;;  %2466 = vmatprep.mubr.msk.f32.mxu1 %vm2831_vm0, %v2832_v1 }
 0x847   :  { %2671 = vmatprep.subr.bf16.mxu1 %v2830_v0 }
 0x84a   :  { %2673 = vmatpush3.bf16.msra.mxu1 %v2874_v13 }
 0x84b   :  { %2680 = vmatprep.subr.bf16.mxu1 %v2830_v0 }
 0x918   :  { %v555_v32 = vpop.f32.mrb[6].mxu1 }
 0x919   :  { %v556_v33 = vadd.f32 %v555_v32, %v2902_v21  ;;  %v2446_v34 = vpop.f32.mrb[7].mxu1 }
 0x91b   :  { %v560_v35 = vrot.slane %v556_v33, 5 }
 0x91d   :  { %569 = vrot.lane.b32.xlu0 %v560_v35, %s2833_s24  ;;  %v562_v36 = vadd.f32 %v560_v35, %v2906_v28 }
 0x91f   :  { %v2244_v37 = vmul.f32 -1.442695, %v562_v36 }
 0x921   :  { %2769 = vpow2.f32 %v2244_v37 }
 0x92b   :  { %v2770_v38 = vpop.eup %2769 }
 0x92c   :  { %v566_v39 = vadd.f32 1.0, %v2770_v38 }
 0x92e   :  { %2771 = vrcp.f32 %v566_v39 }
 0x938   :  { %v2772_v40 = vpop.eup %2771 }
 0x939   :  { %v579_v46 = vsub.f32 1.0, %v2772_v40  ;;  %v587_v49 = vmul.f32 %v2772_v40, %v585_v47 }
 0x98f   :  { %v570_v41 = vpop.permute.xlu0 %569 }
 0x990   :  { %v572_v42 = vmul.f32 %v2772_v40, %v570_v41 }
 0x992   :  { %574 = vrot.lane.b32.xlu1 %v572_v42, %s2833_s24 }
 0xa04   :  { %v575_v43 = vpop.permute.xlu1 %574 }
 0xa05   :  { %v577_v44 = vadd.f32 %v575_v43, %v2906_v28 }
 0xa07   :  { %2773 = vtanh.f32 %v577_v44 }
 0xa11   :  { %v2774_v45 = vpop.eup %2773 }
 0xa12   :  { %581 = vrot.lane.b32.xlu0 %v2774_v45, %s2834_s25 }
 0xa84   :  { %v582_v48 = vpop.permute.xlu0 %581 }
 0xa85   :  { %v584_v50 = vmul.f32 %v582_v48, %v579_v46 }
 0xa87   :  { %v2962_v51 = vadd.f32 %v587_v49, %v584_v50 }
 0xa89   :  { %v597_v52 = vrot.slane %v2962_v51, 3  ;;  %v698_v8 = vrot.slane %v2962_v51, 7 }
 0xa8b   :  { %598 = vrot.lane.b32.xlu1 %v597_v52, %s2834_s25 }
 0xafd   :  { %v599_v53 = vpop.permute.xlu1 %598 }
 0xafe   :  { %2456 = vmatmul.mubr.msk.f32.vlgmr.msra.gmra.mrb[2].mxu0 %vm153_vm4, %v599_v53 }
 0xaff   :  { %2676 = vmatpush3.bf16.msra.mxu0 %v2870_v9  ;;  %2477 = vmatprep.mubr.msk.f32.mxu0 %vm2831_vm0, %v2832_v1 }
 0xb00   :  { %2677 = vmatprep.subr.bf16.mxu0 %v2830_v0 }
 0xb03   :  { %2679 = vmatpush3.bf16.msra.mxu0 %v2874_v13 }
 0xb04   :  { %2491 = vmatprep.subr.mxu0 %v2832_v1 }
 0xbd1   :  { %v668_v54 = vpop.f32.mrb[2].mxu0 }
 0xbd2   :  { %v669_v55 = vadd.f32 %v668_v54, %v2902_v21  ;;  %v2457_v56 = vpop.f32.mrb[3].mxu0 }
 0xbd4   :  { %v673_v57 = vrot.slane %v669_v55, 4 }
 0xbd6   :  { %682 = vrot.lane.b32.xlu0 %v673_v57, %s2833_s24  ;;  %v675_v58 = vadd.f32 %v673_v57, %v2906_v28 }
 0xbd8   :  { %v2246_v59 = vmul.f32 -1.442695, %v675_v58 }
 0xbda   :  { %2775 = vpow2.f32 %v2246_v59 }
 0xbe4   :  { %v2776_v60 = vpop.eup %2775 }
 0xbe5   :  { %v679_v61 = vadd.f32 1.0, %v2776_v60 }
 0xbe7   :  { %2777 = vrcp.f32 %v679_v61 }
 0xbf1   :  { %v2778_v62 = vpop.eup %2777 }
 0xbf2   :  { %v692_v7 = vsub.f32 1.0, %v2778_v62  ;;  %v700_v11 = vmul.f32 %v2778_v62, %v698_v8 }
 0xc48   :  { %v683_v63 = vpop.permute.xlu0 %682 }
 0xc49   :  { %v685_v3 = vmul.f32 %v2778_v62, %v683_v63 }
 0xc4b   :  { %687 = vrot.lane.b32.xlu1 %v685_v3, %s2833_s24 }
 0xcbd   :  { %v688_v4 = vpop.permute.xlu1 %687 }
 0xcbe   :  { %v690_v5 = vadd.f32 %v688_v4, %v2906_v28 }
 0xcc0   :  { %2779 = vtanh.f32 %v690_v5 }
 0xcca   :  { %v2780_v6 = vpop.eup %2779 }
 0xccb   :  { %694 = vrot.lane.b32.xlu0 %v2780_v6, %s2834_s25 }
 0xd3d   :  { %v695_v10 = vpop.permute.xlu0 %694 }
 0xd3e   :  { %v697_v12 = vmul.f32 %v695_v10, %v692_v7 }
 0xd40   :  { %v2980_v14 = vadd.f32 %v700_v11, %v697_v12 }
 0xd42   :  { %v710_v15 = vrot.slane %v2980_v14, 4  ;;  %v811_v34 = vrot.slane %v2980_v14, 7 }
 0xd44   :  { %711 = vrot.lane.b32.xlu1 %v710_v15, %s2834_s25 }
 0xdb6   :  { %v712_v16 = vpop.permute.xlu1 %711 }
 0xdb7   :  { %2467 = vmatmul.mubr.msk.f32.vlgmr.msra.gmra.mrb[8].mxu1 %vm153_vm4, %v712_v16 }
 0xdb8   :  { %2682 = vmatpush3.bf16.msra.mxu1 %v2870_v9  ;;  %2488 = vmatprep.mubr.msk.f32.mxu1 %vm2831_vm0, %v2832_v1 }
 0xdb9   :  { %2683 = vmatprep.subr.bf16.mxu1 %v2830_v0 }
 0xdbc   :  { %2685 = vmatpush3.bf16.msra.mxu1 %v2874_v13 }
 0xdbd   :  { %2686 = vmatprep.subr.bf16.mxu1 %v2830_v0 }
 0xe8a   :  { %v781_v17 = vpop.f32.mrb[8].mxu1 }
 0xe8b   :  { %v782_v18 = vadd.f32 %v781_v17, %v2902_v21  ;;  %v2468_v19 = vpop.f32.mrb[9].mxu1 }
 0xe8d   :  { %v786_v22 = vrot.slane %v782_v18, 3 }
 0xe8f   :  { %795 = vrot.lane.b32.xlu0 %v786_v22, %s2833_s24  ;;  %v788_v23 = vadd.f32 %v786_v22, %v2906_v28 }
 0xe91   :  { %v2248_v24 = vmul.f32 -1.442695, %v788_v23  ;;  %v43_v23 = vld [vmem:[#allocation3 + $0x80] sm:$0xff] }
 0xe93   :  { %2781 = vpow2.f32 %v2248_v24  ;;  %v44_v24 = vld [vmem:[#allocation3 + $0x88] sm:$0xff] }
 0xe9d   :  { %v2782_v9 = vpop.eup %2781 }
 0xe9e   :  { %v792_v25 = vadd.f32 1.0, %v2782_v9  ;;  %v2690_v9 = vpack.c.bf16 %v44_v24, %v43_v23 }
 0xea0   :  { %2783 = vrcp.f32 %v792_v25 }
 0xeaa   :  { %v2784_v26 = vpop.eup %2783 }
 0xeab   :  { %v805_v33 = vsub.f32 1.0, %v2784_v26  ;;  %v813_v36 = vmul.f32 %v2784_v26, %v811_v34 }
 0xf01   :  { %v796_v27 = vpop.permute.xlu0 %795 }
 0xf02   :  { %v798_v30 = vmul.f32 %v2784_v26, %v796_v27 }
 0xf04   :  { %800 = vrot.lane.b32.xlu1 %v798_v30, %s2833_s24 }
 0xf76   :  { %v801_v13 = vpop.permute.xlu1 %800 }
 0xf77   :  { %v803_v31 = vadd.f32 %v801_v13, %v2906_v28 }
 0xf79   :  { %2785 = vtanh.f32 %v803_v31 }
 0xf83   :  { %v2786_v32 = vpop.eup %2785 }
 0xf84   :  { %807 = vrot.lane.b32.xlu0 %v2786_v32, %s2834_s25 }
 0xff6   :  { %v808_v35 = vpop.permute.xlu0 %807 }
 0xff7   :  { %v810_v37 = vmul.f32 %v808_v35, %v805_v33  ;;  %v49_v35 = vld [vmem:[#allocation3 + $0xb0] sm:$0xff] }
 0xff9   :  { %v814_v38 = vadd.f32 %v813_v36, %v810_v37  ;;  %v50_v36 = vld [vmem:[#allocation3 + $0xb8] sm:$0xff] }
 0xffb   :  { %v823_v39 = vrot.slane %v814_v38, 5  ;;  %v924_v57 = vrot.slane %v814_v38, 7 }
 0xffd   :  { %824 = vrot.lane.b32.xlu1 %v823_v39, %s2834_s25  ;;  %v51_v39 = vld [vmem:[#allocation3 + $0xc0] sm:$0xff] }
0x106f   :  { %v825_v40 = vpop.permute.xlu1 %824 }
0x1070   :  { %2478 = vmatmul.mubr.msk.f32.vlgmr.msra.gmra.mrb[4].mxu0 %vm153_vm4, %v825_v40  ;;  %v52_v40 = vld [vmem:[#allocation3 + $0xc8] sm:$0xff] }
0x1071   :  { %2493 = vmatprep.mubr.msk.f32.mxu0 %vm2831_vm0, %v2832_v1 }
0x1143   :  { %v894_v41 = vpop.f32.mrb[4].mxu0 }
0x1144   :  { %v895_v42 = vadd.f32 %v894_v41, %v2902_v21  ;;  %v2479_v43 = vpop.f32.mrb[5].mxu0  ;;  %v3045_v41 = vpack.c.bf16 %v52_v40, %v51_v39 }
0x1146   :  { %v899_v44 = vrot.slane %v895_v42, 2  ;;  %v1123_v42 = vlaneseq }
0x1148   :  { %908 = vrot.lane.b32.xlu0 %v899_v44, %s2833_s24  ;;  %v901_v45 = vadd.f32 %v899_v44, %v2906_v28  ;;  %v1124_v43 = vshrl.u32 %v1123_v42, 7  ;;  %v1126_v44 = vand.u32 127, %v1123_v42 }
0x114a   :  { %v2250_v46 = vmul.f32 -1.442695, %v901_v45  ;;  %v2255_v45 = vadd.s32 4294967294, %v1124_v43 }
0x114c   :  { %2787 = vpow2.f32 %v2250_v46  ;;  %v1129_v46 = vadd.s32 2, %v1124_v43 }
0x1156   :  { %v2788_v47 = vpop.eup %2787 }
0x1157   :  { %v905_v48 = vadd.f32 1.0, %v2788_v47 }
0x1159   :  { %2789 = vrcp.f32 %v905_v48 }
0x1163   :  { %v2790_v49 = vpop.eup %2789 }
0x1164   :  { %v918_v56 = vsub.f32 1.0, %v2790_v49  ;;  %v926_v59 = vmul.f32 %v2790_v49, %v924_v57 }
0x11ba   :  { %v909_v50 = vpop.permute.xlu0 %908 }
0x11bb   :  { %v911_v52 = vmul.f32 %v2790_v49, %v909_v50 }
0x11bd   :  { %913 = vrot.lane.b32.xlu1 %v911_v52, %s2833_s24 }
0x122f   :  { %v914_v53 = vpop.permute.xlu1 %913 }
0x1230   :  { %v916_v54 = vadd.f32 %v914_v53, %v2906_v28 }
0x1232   :  { %2791 = vtanh.f32 %v916_v54 }
0x123c   :  { %v2792_v55 = vpop.eup %2791 }
0x123d   :  { %920 = vrot.lane.b32.xlu0 %v2792_v55, %s2834_s25 }
0x12af   :  { %v921_v58 = vpop.permute.xlu0 %920 }
0x12b0   :  { %v923_v60 = vmul.f32 %v921_v58, %v918_v56  ;;  %v2835_v56 = vmov 64  }
0x12b1   :  { %2750 = vset.pattern.permute.xlu0 %v2835_v56 }
0x12b2   :  { %v927_v61 = vadd.f32 %v926_v59, %v923_v60 }
0x12b4   :  { %v936_v62 = vrot.slane %v927_v61, 6  ;;  %v1037_v26 = vrot.slane %v927_v61, 7 }
0x12b6   :  { %937 = vrot.lane.b32.xlu1 %v936_v62, %s2834_s25 }
0x1328   :  { %v938_v63 = vpop.permute.xlu1 %937 }
0x1329   :  { %2489 = vmatmul.mubr.msk.f32.vlgmr.msra.gmra.mrb[10].mxu1 %vm153_vm4, %v938_v63 }
0x132a   :  { %2504 = vmatprep.mubr.msk.f32.mxu1 %vm2831_vm0, %v2832_v1 }
0x13fc   :  { %v1007_v3 = vpop.f32.mrb[10].mxu1 }
0x13fd   :  { %v1008_v4 = vadd.f32 %v1007_v3, %v2902_v21  ;;  %v2490_v5 = vpop.f32.mrb[11].mxu1 }
0x13ff   :  { %v1012_v6 = vrot.slane %v1008_v4, 1 }
0x1401   :  { %1021 = vrot.lane.b32.xlu0 %v1012_v6, %s2833_s24  ;;  %v1014_v7 = vadd.f32 %v1012_v6, %v2906_v28 }
0x1403   :  { %v2252_v8 = vmul.f32 -1.442695, %v1014_v7 }
0x1405   :  { %2793 = vpow2.f32 %v2252_v8 }
0x140f   :  { %v2794_v10 = vpop.eup %2793 }
0x1410   :  { %v1018_v11 = vadd.f32 1.0, %v2794_v10 }
0x1412   :  { %2795 = vrcp.f32 %v1018_v11 }
0x141c   :  { %v2796_v12 = vpop.eup %2795 }
0x141d   :  { %v1031_v25 = vsub.f32 1.0, %v2796_v12  ;;  %v1039_v27 = vmul.f32 %v2796_v12, %v1037_v26  ;;  %v46_v26 = vld [vmem:[#allocation3 + $0x98] sm:$0xff] }
0x1473   :  { %v1022_v15 = vpop.permute.xlu0 %1021 }
0x1474   :  { %v1024_v16 = vmul.f32 %v2796_v12, %v1022_v15 }
0x1476   :  { %1026 = vrot.lane.b32.xlu1 %v1024_v16, %s2833_s24 }
0x147a   :  { %364 = vrot.lane.b32.xlu1 %v2926_v2, %s2834_s25 }
0x147e   :  { %590 = vrot.lane.b32.xlu1 %v2962_v51, %s2834_s25  ;;  %v42_v51 = vld [vmem:[#allocation3 + $0x78] sm:$0xff] }
0x1482   :  { %816 = vrot.lane.b32.xlu1 %v814_v38, %s2834_s25  ;;  %v3037_v38 = vpack.c.bf16 %v50_v36, %v49_v35 }
0x14e8   :  { %v1027_v21 = vpop.permute.xlu1 %1026 }
0x14e9   :  { %v1029_v17 = vadd.f32 %v1027_v21, %v2906_v28  ;;  %v41_v28 = vld [vmem:[#allocation3 + $0x70] sm:$0xff] }
0x14ea   :  { %v2687_v22 = vpack.c.bf16 %v42_v51, %v41_v28 }
0x14eb   :  { %2797 = vtanh.f32 %v1029_v17 }
0x14ec   :  { %v365_v18 = vpop.permute.xlu1 %364  ;;  %2688 = vmatpush3.bf16.msra.mxu1 %v2687_v22 }
0x14ed   :  { %368 = vst.msk [vmem:[#allocation2] sm:$0x2] %vm367_vm5, %v365_v18  ;;  %2689 = vmatprep.subr.bf16.mxu1 %v2830_v0  ;;  %vm1047_vm5 = vcmask 261255  }
0x14ee   :  { %370 = vst.msk [vmem:[#allocation2 + $0x5] sm:$0x2] %vm369_vm6, %v365_v18  ;;  %vm1128_vm6 = vcmp.ge.s32.totalorder %v1126_v44, %v2255_v45 }
0x14f0   :  { %v591_v19 = vpop.permute.xlu1 %590  ;;  %2691 = vmatpush3.bf16.msra.mxu1 %v2690_v9 }
0x14f1   :  { %594 = vst.msk [vmem:[#allocation2] sm:$0x8] %vm593_vm7, %v591_v19  ;;  %2518 = vmatprep.subr.mxu1 %v2832_v1  ;;  %vm1130_vm7 = vcmp.le.s32.totalorder %v1126_v44, %v1129_v46 }
0x14f2   :  { %596 = vst.msk [vmem:[#allocation2 + $0x1] sm:$0x8] %vm595_vm8, %v591_v19  ;;  %vm1131_vm8 = vmand %vm1128_vm6, %vm1130_vm7 }
0x14f4   :  { %v817_v31 = vpop.permute.xlu1 %816 }
0x14f5   :  { %v2798_v2 = vpop.eup %2797 }
0x14f6   :  { %1033 = vrot.lane.b32.xlu0 %v2798_v2, %s2834_s25 }
0x14fa   :  { %477 = vrot.lane.b32.xlu0 %v2944_v29, %s2834_s25 }
0x14fe   :  { %703 = vrot.lane.b32.xlu0 %v2980_v14, %s2834_s25 }
0x1502   :  { %929 = vrot.lane.b32.xlu0 %v927_v61, %s2834_s25 }
0x1568   :  { %v1034_v29 = vpop.permute.xlu0 %1033 }
0x1569   :  { %v1036_v30 = vmul.f32 %v1034_v29, %v1031_v25  ;;  %v45_v25 = vld [vmem:[#allocation3 + $0x90] sm:$0xff] }
0x156a   :  { %v2699_v29 = vpack.c.bf16 %v46_v26, %v45_v25  ;;  %v69_v25 = vld [vmem:[#allocation3 + $0x150] sm:$0xff] }
0x156b   :  { %v1040_v14 = vadd.f32 %v1039_v27, %v1036_v30  ;;  %v47_v27 = vld [vmem:[#allocation3 + $0xa0] sm:$0xff]  ;;  %v48_v30 = vld [vmem:[#allocation3 + $0xa8] sm:$0xff] }
0x156c   :  { %v478_v13 = vpop.permute.xlu0 %477 }
0x156d   :  { %481 = vst.msk [vmem:[#allocation2] sm:$0x4] %vm480_vm9, %v478_v13  ;;  %1042 = vrot.lane.b32.xlu1 %v1040_v14, %s2834_s25  ;;  %vm1133_vm9 = vcmask 64512   ;;  %v2702_v14 = vpack.c.bf16 %v48_v30, %v47_v27 }
0x156e   :  { %483 = vst.msk [vmem:[#allocation2 + $0x3] sm:$0x4] %vm482_vm10, %v478_v13  ;;  %vm1148_vm10 = vcmp.ge.s32.totalorder %v1126_v44, %v1124_v43 }
0x156f   :  { %820 = vst.msk [vmem:[#allocation2] sm:$0x20] %vm819_vm11, %v817_v31  ;;  %v2256_v4 = vsel %vm1148_vm10, 1.0, %v2832_v1 }
0x1570   :  { %822 = vst.msk [vmem:[#allocation2 - $0x3] sm:$0x20] %vm821_vm12, %v817_v31  ;;  %v704_v32 = vpop.permute.xlu0 %703  ;;  %v1151_v7 = vsub.f32 1.0, %v2256_v4  ;;  %vm1172_vm12 = vcmp.eq.s32.totalorder %v1124_v43, %v1126_v44 }
0x1571   :  { %707 = vst.msk [vmem:[#allocation2] sm:$0x10] %vm706_vm13, %v704_v32 }
0x1572   :  { %709 = vst.msk [vmem:[#allocation2 - $0x1] sm:$0x10] %vm708_vm14, %v704_v32 }
0x1574   :  { %v930_v33 = vpop.permute.xlu0 %929 }
0x1575   :  { %933 = vst.msk [vmem:[#allocation2] sm:$0x40] %vm932_vm15, %v930_v33 }
0x1576   :  { %935 = vst.msk [vmem:[#allocation2 - $0x5] sm:$0x40] %vm934_vm2, %v930_v33 }
0x15df   :  { %v1043_v34 = vpop.permute.xlu1 %1042 }
0x15e0   :  { %1046 = vst.msk [vmem:[#allocation2] sm:$0x80] %vm1045_vm3, %v1043_v34 }
0x15e1   :  { %1048 = vst.msk [vmem:[#allocation2 - $0x7] sm:$0x80] %vm1047_vm5, %v1043_v34 }
0x15e8   :  { %v3031_v37 = vld [vmem:[#allocation2] sm:$0xff] }
0x15e9   :  { %2492 = vmatpush3.xpose.msk.msra.mxu0 %vm153_vm4, %v3031_v37  ;;  %2505 = vmatmul.mubr.msk.f32.vlgmr.msra.gmra.mrb[12].mxu1 %vm153_vm4, %v3031_v37 }
0x15ea   :  { %2692 = vmatprep.subr.bf16.mxu0 %v2830_v0  ;;  %2520 = vmatprep.mubr.msk.f32.mxu1 %vm2831_vm0, %v2832_v1 }
0x15ec   :  { %2494 = vmatmul.mubr.msk.f32.vlgmr.msra.gmra.mrb[6].mxu0 %vm153_vm4, %v3031_v37 }
0x15ed   :  { %2694 = vmatpush3.bf16.msra.mxu0 %v3037_v38  ;;  %2515 = vmatprep.mubr.msk.f32.mxu0 %vm2831_vm0, %v2832_v1 }
0x15ee   :  { %2695 = vmatprep.subr.bf16.mxu0 %v2830_v0 }
0x15f1   :  { %2697 = vmatpush3.bf16.msra.mxu0 %v3045_v41 }
0x15f2   :  { %2523 = vmatprep.subr.mxu0 %v2832_v1 }
0x15f4   :  { %2516 = vmatmul.mubr.msk.f32.vlgmr.msra.gmra.mrb[8].mxu0 %vm153_vm4, %v3031_v37 }
0x15f5   :  { %2525 = vmatprep.mubr.msk.f32.mxu0 %vm2831_vm0, %v2832_v1 }
0x16bc   :  { %v1243_v47 = vpop.f32.mrb[12].mxu1 }
0x16bd   :  { %1318 = vrot.lane.b32.xlu1 %v1243_v47, %s2834_s25  ;;  %v2506_v48 = vpop.f32.mrb[13].mxu1  ;;  %2524 = vmatpush3.msra.mxu0 %v1243_v47 }
0x16be   :  { %2533 = vmatprep.subr.mxu0 %v2832_v1 }
0x16bf   :  { %v1119_v49 = vpop.f32.mrb[6].mxu0 }
0x16c0   :  { %v1132_v50 = vsel %vm1131_vm8, %v1119_v49, 0.0  ;;  %v2495_v52 = vpop.f32.mrb[7].mxu0 }
0x16c1   :  { %v1134_v53 = vsel %vm1133_vm9, %v1132_v50, -inf }
0x16c2   :  { %1135 = vmax.xlane.f32.xlu0 %v1134_v53 }
0x16c7   :  { %v3059_v54 = vpop.f32.mrb[8].mxu0 }
0x16c8   :  { %v2517_v55 = vpop.f32.mrb[9].mxu0 }
0x16c9   :  { %v54_v55 = vld [vmem:[#allocation3 + $0xd8] sm:$0xff] }
0x16d8   :  { %1153 = vperm.xlu0 %2750, %v2889_v20   ;;  %v2257_v20 = vld [vmem:[%s3148_s0 + $0x8] ss:$0 sm:$0xff] }
0x172f   :  { %v1319_v57 = vpop.permute.xlu1 %1318 }
0x1730   :  { %2519 = vmatpush3.msra.mxu1 %v1319_v57  ;;  %v55_v57 = vld [vmem:[#allocation3 + $0xe0] sm:$0xff] }
0x1731   :  { %2528 = vmatprep.subr.mxu1 %v2832_v1 }
0x174f   :  { %v1136_v58 = vpop.xlane.xlu0 %1135 }
0x1750   :  { %v1137_v59 = vsub.f32 %v1132_v50, %v1136_v58  ;;  %v56_v58 = vld [vmem:[#allocation3 + $0xe8] sm:$0xff] }
0x1752   :  { %v1138_v60 = vmul.f32 1.442695, %v1137_v59  ;;  %v2714_v59 = vpack.c.bf16 %v56_v58, %v55_v57 }
0x1754   :  { %2799 = vpow2.f32 %v1138_v60  ;;  %v57_v60 = vld [vmem:[#allocation3 + $0xf0] sm:$0xff] }
0x1757   :  { %v1154_v3 = vpop.permute.xlu0 %1153 }
0x1758   :  { %vm1160_vm11 = vcmp.eq.f32.partialorder %v1154_v3, %v2257_v20 }
0x1759   :  { %v2258_v8 = vsel %vm1160_vm11, 1.0, %v2832_v1 }
0x175a   :  { %v1163_v12 = vsub.f32 1.0, %v2258_v8  ;;  %v1164_v15 = vmul.f32 %v2258_v8, %v2256_v4  ;;  %v1166_v16 = vmul.f32 %v2258_v8, %v1151_v7  ;;  %v62_v8 = vld [vmem:[#allocation3 + $0x118] sm:$0xff] }
0x175c   :  { %v1168_v2 = vmul.f32 %v2256_v4, %v1163_v12  ;;  %v1170_v28 = vmul.f32 %v1163_v12, %v1151_v7 }
0x175e   :  { %v2800_v61 = vpop.eup %2799 }
0x175f   :  { %v1140_v62 = vsel %vm1133_vm9, %v2800_v61, 0.0 }
0x1760   :  { %1141 = vadd.xlane.f32.xlu1 %v1140_v62 }
0x1771   :  { %1467 = vrot.lane.b32.xlu1 %v1243_v47, %s2833_s24 }
0x1775   :  { %1544 = vrot.lane.b32.xlu1 %v1243_v47, %s2836_s26 }
0x17ed   :  { %v1142_v63 = vpop.xlane.xlu1 %1141 }
0x17ee   :  { %2801 = vrcp.f32 %v1142_v63 }
0x17f1   :  { %v1468_v21 = vpop.permute.xlu1 %1467 }
0x17f5   :  { %v1545_v23 = vpop.permute.xlu1 %1544 }
0x17f8   :  { %v2802_v5 = vpop.eup %2801 }
0x17f9   :  { %v1144_v6 = vmul.f32 %v2802_v5, %v1142_v63  ;;  %v59_v63 = vld [vmem:[#allocation3 + $0x100] sm:$0xff] }
0x17fb   :  { %v1145_v10 = vsub.f32 2.0, %v1144_v6 }
0x17fd   :  { %v1146_v11 = vmul.f32 %v2802_v5, %v1145_v10  ;;  %v63_v10 = vld [vmem:[#allocation3 + $0x120] sm:$0xff] }
0x17fe   :  { %v2723_v12 = vpack.c.bf16 %v63_v10, %v62_v8 }
0x17ff   :  { %v1147_v17 = vmul.f32 %v2800_v61, %v1146_v11  ;;  %v58_v61 = vld [vmem:[#allocation3 + $0xf8] sm:$0xff]  ;;  %v64_v11 = vld [vmem:[#allocation3 + $0x128] sm:$0xff] }
0x1800   :  { %v2717_v62 = vpack.c.bf16 %v58_v61, %v57_v60 }
0x1801   :  { %v1165_v18 = vmul.f32 %v1164_v15, %v1147_v17  ;;  %v3071_v19 = vmul.f32 %v1166_v16, %v1147_v17  ;;  %v1173_v51 = vsel %vm1172_vm12, %v1147_v17, 0.0  ;;  %v3077_v24 = vmul.f32 %v1168_v2, %v1147_v17  ;;  %v65_v15 = vld [vmem:[#allocation3 + $0x130] sm:$0xff]  ;;  %v67_v2 = vld [vmem:[#allocation3 + $0x140] sm:$0xff] }
0x1802   :  { %v1174_v22 = vsel %vm1133_vm9, %v1173_v51, 0.0  ;;  %v3079_v9 = vmul.f32 %v1170_v28, %v1147_v17 }
0x1803   :  { %2521 = vmatmul.mubr.msk.f32.vlgmr.msra.gmra.mrb[14].mxu1 %vm1133_vm9, %v3071_v19  ;;  %2526 = vmatmul.mubr.msk.f32.vlgmr.msra.gmra.mrb[10].mxu0 %vm1133_vm9, %v1165_v18 }
0x1804   :  { %1175 = vadd.xlane.f32.xlu1 %v1174_v22  ;;  %2529 = vmatpush3.msra.mxu1 %v1468_v21 }
0x1805   :  { %2534 = vmatpush3.msra.mxu0 %v1545_v23  ;;  %2530 = vmatprep.mubr.msk.f32.mxu1 %vm2831_vm0, %v2832_v1 }
0x1806   :  { %2535 = vmatprep.mubr.msk.f32.mxu0 %vm2831_vm0, %v2832_v1  ;;  %2698 = vmatprep.subr.bf16.mxu1 %v2830_v0 }
0x1807   :  { %2531 = vmatmul.mubr.msk.f32.vlgmr.msra.gmra.mrb[16].mxu1 %vm1133_vm9, %v3077_v24  ;;  %2536 = vmatmul.mubr.msk.f32.vlgmr.msra.gmra.mrb[12].mxu0 %vm1133_vm9, %v3079_v9 }
0x1808   :  { %2704 = vmatprep.subr.bf16.mxu0 %v2830_v0  ;;  %2546 = vmatprep.mubr.msk.f32.mxu1 %vm2831_vm0, %v2832_v1 }
0x1809   :  { %2706 = vmatpush3.bf16.msra.mxu0 %v3037_v38  ;;  %2557 = vmatprep.mubr.msk.f32.mxu0 %vm2831_vm0, %v2832_v1 }
0x180a   :  { %2707 = vmatprep.subr.bf16.mxu0 %v2830_v0  ;;  %2700 = vmatpush3.bf16.msra.mxu1 %v2699_v29 }
0x180b   :  { %2701 = vmatprep.subr.bf16.mxu1 %v2830_v0 }
0x180d   :  { %2709 = vmatpush3.bf16.msra.mxu0 %v3045_v41 }
0x180e   :  { %2565 = vmatprep.subr.mxu0 %v2832_v1  ;;  %2703 = vmatpush3.bf16.msra.mxu1 %v2702_v14  ;;  %v70_v14 = vld [vmem:[#allocation3 + $0x158] sm:$0xff] }
0x180f   :  { %2560 = vmatprep.subr.mxu1 %v2832_v1 }
0x1891   :  { %v1176_v35 = vpop.xlane.xlu1 %1175 }
0x1892   :  { %v1621_v42 = vmul.f32 %v3059_v54, %v1176_v35  ;;  %v53_v54 = vld [vmem:[#allocation3 + $0xd0] sm:$0xff] }
0x1893   :  { %v2711_v56 = vpack.c.bf16 %v54_v55, %v53_v54 }
0x18d6   :  { %v1390_v13 = vpop.f32.mrb[14].mxu1  ;;  %v1463_v31 = vpop.f32.mrb[10].mxu0 }
0x18d7   :  { %v1464_v32 = vadd.f32 %v1463_v31, %v1390_v13  ;;  %v2522_v33 = vpop.f32.mrb[15].mxu1  ;;  %v2527_v34 = vpop.f32.mrb[11].mxu0  ;;  %v71_v13 = vld [vmem:[#allocation3 + $0x160] sm:$0xff] }
0x18d8   :  { %v72_v33 = vld [vmem:[#allocation3 + $0x168] sm:$0xff]  ;;  %v73_v34 = vld [vmem:[#allocation3 + $0x170] sm:$0xff] }
0x18da   :  { %v1539_v36 = vpop.f32.mrb[16].mxu1  ;;  %v1616_v38 = vpop.f32.mrb[12].mxu0 }
0x18db   :  { %v1543_v39 = vadd.f32 %v1539_v36, %v1464_v32  ;;  %v2532_v40 = vpop.f32.mrb[17].mxu1  ;;  %v2537_v41 = vpop.f32.mrb[13].mxu0  ;;  %v2735_v32 = vpack.c.bf16 %v71_v13, %v70_v14  ;;  %v2271_v36 = vld [vmem:[#allocation3 + $0x110] ss:$0 sm:$0xff] }
0x18dd   :  { %v1620_v43 = vadd.f32 %v1616_v38, %v1543_v39 }
0x18df   :  { %v1622_v44 = vadd.f32 %v1621_v42, %v1620_v43 }
0x18e1   :  { %v1623_v45 = vmax.f32 %v1622_v44, 0.0  ;;  %v2273_v44 = vld [vmem:[#allocation3 + $0x178] ss:$0 sm:$0xff] }
0x18e3   :  { %2547 = vmatmul.mubr.msk.f32.vlgmr.msra.gmra.mrb[18].mxu1 %vm153_vm4, %v1623_v45  ;;  %2558 = vmatmul.mubr.msk.f32.vlgmr.msra.gmra.mrb[14].mxu0 %vm153_vm4, %v1623_v45 }
0x18e4   :  { %2567 = vmatprep.mubr.msk.f32.mxu0 %vm2831_vm0, %v2832_v1  ;;  %2562 = vmatprep.mubr.msk.f32.mxu1 %vm2831_vm0, %v2832_v1 }
0x19b6   :  { %v1693_v46 = vpop.f32.mrb[18].mxu1  ;;  %v1763_v47 = vpop.f32.mrb[14].mxu0 }
0x19b7   :  { %1768 = vrot.lane.b32.xlu0 %v1693_v46, %s2834_s25  ;;  %v2548_v48 = vpop.f32.mrb[19].mxu1  ;;  %v2559_v49 = vpop.f32.mrb[15].mxu0  ;;  %2566 = vmatpush3.msra.mxu0 %v1693_v46  ;;  %v2059_v50 = vmul.f32 %v1763_v47, %v1176_v35  ;;  %v2738_v35 = vpack.c.bf16 %v73_v34, %v72_v33 }
0x19b8   :  { %2568 = vmatmul.mubr.msk.f32.vlgmr.msra.gmra.mrb[16].mxu0 %vm1133_vm9, %v1165_v18  ;;  %2575 = vmatprep.subr.mxu0 %v2832_v1  ;;  %v2726_v18 = vpack.c.bf16 %v65_v15, %v64_v11 }
0x19b9   :  { %2577 = vmatprep.mubr.msk.f32.mxu0 %vm2831_vm0, %v2832_v1 }
0x19bb   :  { %1911 = vrot.lane.b32.xlu0 %v1693_v46, %s2833_s24 }
0x19bf   :  { %1985 = vrot.lane.b32.xlu0 %v1693_v46, %s2836_s26 }
0x19c3   :  { %2061 = vrot.lane.b32.xlu0 %v2059_v50, %s2834_s25 }
0x19c7   :  { %2066 = vrot.lane.b32.xlu0 %v3031_v37, %s2836_s26 }
0x1a29   :  { %v1769_v52 = vpop.permute.xlu0 %1768 }
0x1a2a   :  { %2561 = vmatpush3.msra.mxu1 %v1769_v52 }
0x1a2b   :  { %2563 = vmatmul.mubr.msk.f32.vlgmr.msra.gmra.mrb[20].mxu1 %vm1133_vm9, %v3071_v19  ;;  %2570 = vmatprep.subr.mxu1 %v2832_v1  ;;  %v66_v19 = vld [vmem:[#allocation3 + $0x138] sm:$0xff] }
0x1a2c   :  { %2572 = vmatprep.mubr.msk.f32.mxu1 %vm2831_vm0, %v2832_v1 }
0x1a2d   :  { %v1912_v53 = vpop.permute.xlu0 %1911 }
0x1a2e   :  { %2571 = vmatpush3.msra.mxu1 %v1912_v53 }
0x1a2f   :  { %2573 = vmatmul.mubr.msk.f32.vlgmr.msra.gmra.mrb[22].mxu1 %vm1133_vm9, %v3077_v24  ;;  %2710 = vmatprep.subr.bf16.mxu1 %v2830_v0  ;;  %v2729_v24 = vpack.c.bf16 %v67_v2, %v66_v19 }
0x1a30   :  { %2596 = vmatprep.mubr.msk.f32.mxu1 %vm2831_vm0, %v2832_v1  ;;  %2712 = vmatpush3.bf16.msra.mxu1 %v2711_v56 }
0x1a31   :  { %v1986_v37 = vpop.permute.xlu0 %1985  ;;  %2713 = vmatprep.subr.bf16.mxu1 %v2830_v0 }
0x1a32   :  { %2576 = vmatpush3.msra.mxu0 %v1986_v37 }
0x1a33   :  { %2578 = vmatmul.mubr.msk.f32.vlgmr.msra.gmra.mrb[18].mxu0 %vm1133_vm9, %v3079_v9  ;;  %2722 = vmatprep.subr.bf16.mxu0 %v2830_v0  ;;  %v68_v9 = vld [vmem:[#allocation3 + $0x148] sm:$0xff] }
0x1a34   :  { %2623 = vmatprep.mubr.msk.f32.mxu0 %vm2831_vm0, %v2832_v1  ;;  %2715 = vmatpush3.bf16.msra.mxu1 %v2714_v59  ;;  %v60_v1 = vld [vmem:[#allocation3 + $0x108] sm:$0xff]  ;;  %v2732_v27 = vpack.c.bf16 %v69_v25, %v68_v9  ;;  %vm2156_vm0 = vcmask 785408  }
0x1a35   :  { %2716 = vmatprep.subr.bf16.mxu1 %v2830_v0  ;;  %v2720_v3 = vpack.c.bf16 %v60_v1, %v59_v63  ;;  %2724 = vmatpush3.bf16.msra.mxu0 %v2723_v12  ;;  %v2062_v28 = vpop.permute.xlu0 %2061 }
0x1a36   :  { %2725 = vmatprep.subr.bf16.mxu0 %v2830_v0 }
0x1a38   :  { %2718 = vmatpush3.bf16.msra.mxu1 %v2717_v62 }
0x1a39   :  { %2719 = vmatprep.subr.bf16.mxu1 %v2830_v0  ;;  %2727 = vmatpush3.bf16.msra.mxu0 %v2726_v18  ;;  %v2067_v30 = vpop.permute.xlu0 %2066 }
0x1a3a   :  { %2728 = vmatprep.subr.bf16.mxu0 %v2830_v0 }
0x1a3c   :  { %2721 = vmatpush3.bf16.msra.mxu1 %v2720_v3 }
0x1a3d   :  { %2730 = vmatpush3.bf16.msra.mxu0 %v2729_v24 }
0x1a3e   :  { %2731 = vmatprep.subr.bf16.mxu0 %v2830_v0 }
0x1a41   :  { %2733 = vmatpush3.bf16.msra.mxu0 %v2732_v27 }
0x1a42   :  { %2734 = vmatprep.subr.bf16.mxu0 %v2830_v0 }
0x1a45   :  { %2736 = vmatpush3.bf16.msra.mxu0 %v2735_v32 }
0x1a46   :  { %2737 = vmatprep.subr.bf16.mxu0 %v2830_v0 }
0x1a49   :  { %2739 = vmatpush3.bf16.msra.mxu0 %v2738_v35 }
0x1a8b   :  { %v1907_v20 = vpop.f32.mrb[16].mxu0 }
0x1a8c   :  { %v2569_v4 = vpop.f32.mrb[17].mxu0 }
0x1afe   :  { %v1837_v5 = vpop.f32.mrb[20].mxu1 }
0x1aff   :  { %v1908_v6 = vadd.f32 %v1907_v20, %v1837_v5  ;;  %v2564_v7 = vpop.f32.mrb[21].mxu1 }
0x1b02   :  { %v1980_v16 = vpop.f32.mrb[22].mxu1 }
0x1b03   :  { %v1984_v21 = vadd.f32 %v1980_v16, %v1908_v6  ;;  %v2574_v17 = vpop.f32.mrb[23].mxu1 }
0x1b06   :  { %v2054_v51 = vpop.f32.mrb[18].mxu0 }
0x1b07   :  { %v2058_v22 = vadd.f32 %v2054_v51, %v1984_v21  ;;  %v2579_v23 = vpop.f32.mrb[19].mxu0 }
0x1b09   :  { %v2064_v26 = vadd.f32 %v2062_v28, %v2058_v22 }
0x1b0b   :  { %v2065_v29 = vmax.f32 %v2064_v26, 0.0 }
0x1b0d   :  { %v2069_v31 = vsel %vm153_vm4, %v2065_v29, %v2067_v30 }
0x1b0e   :  { %2148 = vrot.lane.b32.xlu0 %v2069_v31, %s2836_s26  ;;  %2597 = vmatmul.mubr.msk.f32.vlgmr.msra.gmra.mrb[24].mxu1 %vm79_vm1, %v2069_v31 }
0x1b80   :  { %v2149_v42 = vpop.permute.xlu0 %2148 }
0x1be1   :  { %v2143_v38 = vpop.f32.mrb[24].mxu1 }
0x1be2   :  { %v2144_v39 = vadd.f32 %v2271_v36, %v2143_v38  ;;  %v2598_v40 = vpop.f32.mrb[25].mxu1 }
0x1be4   :  { %v2147_v41 = vmax.f32 %v2144_v39, 0.0 }
0x1be6   :  { %v2151_v43 = vsel %vm153_vm4, %v2147_v41, %v2149_v42 }
0x1be7   :  { %2624 = vmatmul.mubr.msk.f32.vlgmr.msra.gmra.mrb[20].mxu0 %vm2156_vm0, %v2151_v43 }
0x1cba   :  { %v2226_v45 = vpop.f32.mrb[20].mxu0 }
0x1cbb   :  { %v2227_v46 = vadd.f32 %v2273_v44, %v2226_v45  ;;  %v2625_v47 = vpop.f32.mrb[21].mxu0 }
0x1cbd   :  { %2230 = vst [vmem:[%s3150_s2] sm:$0xff] %v2227_v46 }
0x1cbe   :  { %2235 = vsyncpa [#allocation4], 1 }

</bundles_post_ra>
